<compile_context>
chip_gen: v5e
topology: v5e:2x2
jax: 0.10.0
libtpu: 0.0.40
codegen_flags: <defaults>
</compile_context>

<pallas_src>
import functools

import jax
import jax.numpy as jnp
from jax import lax
from jax.experimental import pallas as pl
from jax.experimental.pallas import tpu as pltpu


def _round_up(x: int, m: int) -> int:
    return ((x + m - 1) // m) * m


def _cdiv(a: int, b: int) -> int:
    return -(-a // b)


def _ffn_kernel(x_ref, w1_ref, b1_ref, w2_ref, b2_ref, o_ref, h_ref, *acc,
                tl: int, cp: int, seq_len: int, n_h: int):
    """One (batch, L-tile, H-chunk) grid step.

    x_ref : (1, 1, tl+4, cp)  input tile with a 2-row halo on each side
    w1_ref: (3, cp, th)       conv1 taps for this H chunk (compute dtype)
    b1_ref: (1, th)           f32
    w2_ref: (3, th, cp)       conv2 taps for this H chunk (compute dtype)
    b2_ref: (1, cp)           f32
    o_ref : (1, tl, cp)       output block (x dtype), written at last H chunk
    h_ref : (tl+2, th)        VMEM scratch: ReLU'd hidden with 1-row halo
    acc   : ((tl, cp) f32 VMEM scratch,) accumulator, only when n_h > 1
    """
    l = pl.program_id(1)
    hc = pl.program_id(2)

    # ---- conv1 (+bias, ReLU) over tl+2 rows (tile rows + 1-row halo) --------
    # The shifted operands are free overlapping ref slices of the halo'd tile.
    x_m1 = x_ref[0, 0, 0:tl + 2, :]      # x[t-1]
    x_00 = x_ref[0, 0, 1:tl + 3, :]      # x[t]
    x_p1 = x_ref[0, 0, 2:tl + 4, :]      # x[t+1]
    acc1 = (jnp.dot(x_m1, w1_ref[0], preferred_element_type=jnp.float32)
            + jnp.dot(x_00, w1_ref[1], preferred_element_type=jnp.float32)
            + jnp.dot(x_p1, w1_ref[2], preferred_element_type=jnp.float32))
    h = jnp.maximum(acc1 + b1_ref[...], 0.0)            # bias + ReLU in f32

    # Zero hidden rows outside the true sequence [0, seq_len): the second conv
    # must see PyTorch's zero padding of the hidden (also guards L-padding).
    r = lax.broadcasted_iota(jnp.int32, (tl + 2, 1), 0)
    pos = l * tl - 1 + r                                 # global hidden row
    h = jnp.where((pos >= 0) & (pos < seq_len), h, 0.0)
    h_ref[...] = h.astype(h_ref.dtype)

    # ---- conv2 partial for this H chunk (f32 accumulation) ------------------
    part = (jnp.dot(h_ref[0:tl, :], w2_ref[0], preferred_element_type=jnp.float32)
            + jnp.dot(h_ref[1:tl + 1, :], w2_ref[1], preferred_element_type=jnp.float32)
            + jnp.dot(h_ref[2:tl + 2, :], w2_ref[2], preferred_element_type=jnp.float32))

    if n_h == 1:
        # Single H chunk: fold b2 and write the output once, in o_ref.dtype.
        o_ref[0] = (part + b2_ref[...]).astype(o_ref.dtype)
    else:
        acc_ref = acc[0]

        @pl.when(hc == 0)
        def _init():                                     # fold b2 into chunk 0
            acc_ref[...] = part + b2_ref[...]

        @pl.when(hc > 0)
        def _acc():
            acc_ref[...] = acc_ref[...] + part

        @pl.when(hc == n_h - 1)
        def _store():                                    # single HBM write/tile
            o_ref[0] = acc_ref[...].astype(o_ref.dtype)


def feed_forward_pallas(x_ncl, w1, b1, w2, b2, *,
                        compute_dtype=jnp.bfloat16,
                        tile_l=512,
                        tile_h=None):
    """FeedForward forward pass.  x_ncl: (B, d_model, L) -> (B, d_model, L)."""
    B, C, L = x_ncl.shape
    H = w1.shape[0]
    assert w1.shape == (H, C, 3) and w2.shape == (C, H, 3)
    assert b1.shape == (H,) and b2.shape == (C,)

    LANE, SUB = 128, 8
    Cp = _round_up(C, LANE)                              # lane-dense channels
    isz = jnp.dtype(compute_dtype).itemsize
    out_dtype = x_ncl.dtype
    out_isz = jnp.dtype(out_dtype).itemsize

    # --- chip-aware VMEM budget (v7x: 64 MiB, v5e/v6e: 128 MiB) --------------
    try:
        vmem_cap = int(pltpu.get_tpu_info().vmem_capacity_bytes)
    except Exception:
        vmem_cap = 64 * 1024 * 1024                      # conservative (v7x)
    vmem_budget = vmem_cap - 8 * 1024 * 1024             # headroom
    weight_budget = int(vmem_budget * 0.6)

    def _wchunk_bytes(th, bufs):                         # w1+w2 chunk + biases
        return bufs * (2 * 3 * Cp * th * isz + (th + Cp) * 4)

    # --- H-chunk size: prefer full residency, else largest 256-aligned TH ----
    if tile_h is not None:
        align = 256 if H >= 256 else LANE
        TH = _round_up(min(tile_h, H), align)
    else:
        TH_full = _round_up(H, LANE)
        if _wchunk_bytes(TH_full, 2) <= weight_budget:
            TH = TH_full
        else:
            TH = 256
            max_th = _round_up(H, 256)
            while TH + 256 <= max_th and _wchunk_bytes(TH + 256, 2) <= weight_budget:
                TH += 256
    Hp = _round_up(H, TH)
    n_h = Hp // TH

    # --- L tiling (large tiles; keep both v7x TensorCores busy) --------------
    TL = min(_round_up(L, SUB), _round_up(tile_l, SUB))
    n_l = _cdiv(L, TL)
    if B * n_l < 2 and L > 2 * SUB:
        TL = _round_up(_cdiv(L, 2), SUB)
        n_l = _cdiv(L, TL)
    Lp = n_l * TL

    # --- parameters: (Cout, Cin, K) -> (K, Cin_pad, Cout_pad), compute dtype --
    w1t = jnp.pad(jnp.transpose(w1, (2, 1, 0)),
                  ((0, 0), (0, Cp - C), (0, Hp - H))).astype(compute_dtype)
    w2t = jnp.pad(jnp.transpose(w2, (2, 1, 0)),
                  ((0, 0), (0, Hp - H), (0, Cp - C))).astype(compute_dtype)
    b1p = jnp.pad(b1, (0, Hp - H)).astype(jnp.float32).reshape(1, Hp)
    b2p = jnp.pad(b2, (0, Cp - C)).astype(jnp.float32).reshape(1, Cp)

    # --- activations: NCL -> halo'd, lane-padded (B, n_l, TL+4, Cp) tiles -----
    x_pad = jnp.pad(x_ncl, ((0, 0), (0, Cp - C), (2, Lp - L + 2)))
    win = (jnp.arange(n_l) * TL)[:, None] + jnp.arange(TL + 4)[None, :]
    xh = jnp.transpose(x_pad[:, :, win], (0, 2, 3, 1)).astype(compute_dtype)

    # --- VMEM accounting (double-buffered upper bound) ------------------------
    vmem_need = (_wchunk_bytes(TH, 2)                    # weight/bias blocks
                 + 2 * (TL + 4) * Cp * isz               # halo'd x blocks x2
                 + 2 * TL * Cp * out_isz                 # output blocks x2
                 + (TL + 2) * TH * isz                   # hidden scratch
                 + (TL * Cp * 4 if n_h > 1 else 0))      # f32 accumulator
    vmem_limit = int(min(max(int(1.25 * vmem_need), 32 * 1024 * 1024),
                         vmem_budget))

    kernel = functools.partial(_ffn_kernel, tl=TL, cp=Cp, seq_len=L, n_h=n_h)
    scratch = [pltpu.VMEM((TL + 2, TH), compute_dtype)]
    if n_h > 1:
        scratch.append(pltpu.VMEM((TL, Cp), jnp.float32))

    def _run(single_buffer_weights: bool):
        def wspec(shape, index_map):
            if single_buffer_weights:
                return pl.BlockSpec(shape, index_map,
                                    pipeline_mode=pl.Buffered(1))
            return pl.BlockSpec(shape, index_map)

        grid_spec = pltpu.PrefetchScalarGridSpec(
            num_scalar_prefetch=0,
            grid=(B, n_l, n_h),
            in_specs=[
                pl.BlockSpec((1, 1, TL + 4, Cp), lambda b, l, h: (b, l, 0, 0)),
                wspec((3, Cp, TH), lambda b, l, h: (0, 0, h)),
                wspec((1, TH), lambda b, l, h: (0, h)),
                wspec((3, TH, Cp), lambda b, l, h: (0, h, 0)),
                wspec((1, Cp), lambda b, l, h: (0, 0)),
            ],
            out_specs=pl.BlockSpec((1, TL, Cp), lambda b, l, h: (b, l, 0)),
            scratch_shapes=scratch,
        )
        return pl.pallas_call(
            kernel,
            out_shape=jax.ShapeDtypeStruct((B, Lp, Cp), out_dtype),
            grid_spec=grid_spec,
            compiler_params=pltpu.CompilerParams(
                dimension_semantics=("parallel", "parallel", "arbitrary"),
                vmem_limit_bytes=vmem_limit,
            ),
        )(xh, w1t, b1p, w2t, b2p)

    if n_h == 1:
        # Constant-index weight/bias blocks: single-buffer them (second
        # pipeline buffer is wasted VMEM).  Fall back if unsupported.
        try:
            out_blc = _run(True)
        except Exception:
            out_blc = _run(False)
    else:
        out_blc = _run(False)

    # (B, Lp, Cp) -> (B, C, L): drop padding, return to PyTorch's NCL layout.
    return jnp.transpose(out_blc[:, :L, :C], (0, 2, 1))


def feed_forward_ref(x_ncl, w1, b1, w2, b2, compute_dtype=jnp.float32):
    """Pure-JAX reference (lax conv) mirroring the kernel's cast points."""
    f32 = jnp.float32
    dn = ('NCH', 'OIH', 'NCH')
    xq = x_ncl.astype(compute_dtype).astype(f32)
    w1q = w1.astype(compute_dtype).astype(f32)
    w2q = w2.astype(compute_dtype).astype(f32)
    h = lax.conv_general_dilated(xq, w1q, window_strides=(1,),
                                 padding=((1, 1),), dimension_numbers=dn)
    h = jnp.maximum(h + b1[None, :, None], 0.0)
    h = h.astype(compute_dtype).astype(f32)
    y = lax.conv_general_dilated(h, w2q, window_strides=(1,),
                                 padding=((1, 1),), dimension_numbers=dn)
    return y + b2[None, :, None]


if __name__ == "__main__":
    key = jax.random.PRNGKey(0)
    kx1, kp1, kx2, kp2 = jax.random.split(key, 4)

    def make_params(k, d_model):
        Hh = 4 * d_model
        k1, k2, k3, k4 = jax.random.split(k, 4)
        bound1 = 1.0 / (d_model * 3) ** 0.5
        bound2 = 1.0 / (Hh * 3) ** 0.5
        w1 = jax.random.uniform(k1, (Hh, d_model, 3), jnp.float32, -bound1, bound1)
        b1 = jax.random.uniform(k2, (Hh,), jnp.float32, -bound1, bound1)
        w2 = jax.random.uniform(k3, (d_model, Hh, 3), jnp.float32, -bound2, bound2)
        b2 = jax.random.uniform(k4, (d_model,), jnp.float32, -bound2, bound2)
        return w1, b1, w2, b2

    # --- Check 1: f32 path, d_model=16, L=16 (single L tile, single H chunk,
    #     exercises the single-buffered constant-index weight path) ----------
    B, C, L = 2, 16, 16
    x = jax.random.normal(kx1, (B, C, L), jnp.float32)
    w1, b1, w2, b2 = make_params(kp1, C)
    out = jax.block_until_ready(
        feed_forward_pallas(x, w1, b1, w2, b2, compute_dtype=jnp.float32))
    ref = jax.block_until_ready(feed_forward_ref(x, w1, b1, w2, b2, jnp.float32))
    assert out.shape == (B, C, L), out.shape
    assert jnp.allclose(out, ref, atol=1e-3, rtol=1e-3), \
        float(jnp.max(jnp.abs(out - ref)))

    # --- Check 2: bf16 path, d_model=128, L=300 (multi L tiles + 2 H chunks,
    #     L not a multiple of the tile -> exercises halo + boundary masking
    #     + the f32 scratch accumulator / last-chunk store path) --------------
    B, C, L = 2, 128, 300
    x = jax.random.normal(kx2, (B, C, L), jnp.float32)
    w1, b1, w2, b2 = make_params(kp2, C)
    out = jax.block_until_ready(
        feed_forward_pallas(x, w1, b1, w2, b2,
                            compute_dtype=jnp.bfloat16, tile_l=128, tile_h=256))
    ref = jax.block_until_ready(feed_forward_ref(x, w1, b1, w2, b2, jnp.bfloat16))
    assert out.shape == (B, C, L), out.shape
    assert jnp.allclose(out, ref, atol=1e-2, rtol=1e-2), \
        float(jnp.max(jnp.abs(out - ref)))

    print("KERNEL_OK")
</pallas_src>

<mosaic_0001>
module attributes {stable_mosaic.version = 11 : i64} {
  func.func @_ffn_kernel(%arg0: i32, %arg1: i32, %arg2: i32, %arg3: memref<1x1x20x128xf32, #tpu.memory_space<vmem>>, %arg4: memref<3x128x128xf32, #tpu.memory_space<vmem>>, %arg5: memref<1x128xf32, #tpu.memory_space<vmem>>, %arg6: memref<3x128x128xf32, #tpu.memory_space<vmem>>, %arg7: memref<1x128xf32, #tpu.memory_space<vmem>>, %arg8: memref<1x16x128xf32, #tpu.memory_space<vmem>>, %arg9: memref<18x128xf32, #tpu.memory_space<vmem>>) attributes {dimension_semantics = [#tpu.dimension_semantics<parallel>, #tpu.dimension_semantics<parallel>, #tpu.dimension_semantics<arbitrary>], iteration_bounds = array<i64: 2, 1, 1>, scalar_prefetch = 0 : i64, scratch_operands = 1 : i64, tpu.core_type = #tpu.core_type<tc>, window_params = [{transform_indices = @transform_0, window_bounds = array<i64: 1, 1, 20, 128>}, {pipeline_mode = #tpu.pipeline_mode<synchronous>, transform_indices = @transform_1, window_bounds = array<i64: 3, 128, 128>}, {pipeline_mode = #tpu.pipeline_mode<synchronous>, transform_indices = @transform_2, window_bounds = array<i64: 1, 128>}, {pipeline_mode = #tpu.pipeline_mode<synchronous>, transform_indices = @transform_3, window_bounds = array<i64: 3, 128, 128>}, {pipeline_mode = #tpu.pipeline_mode<synchronous>, transform_indices = @transform_4, window_bounds = array<i64: 1, 128>}, {transform_indices = @transform_5, window_bounds = array<i64: 1, 16, 128>}]} {
    %c0 = arith.constant 0 : index
    %c0_0 = arith.constant 0 : index
    %c0_1 = arith.constant 0 : index
    %c0_2 = arith.constant 0 : index
    %0 = vector.load %arg3[%c0, %c0_0, %c0_1, %c0_2] : memref<1x1x20x128xf32, #tpu.memory_space<vmem>>, vector<1x1x18x128xf32>
    %1 = vector.shape_cast %0 : vector<1x1x18x128xf32> to vector<18x128xf32>
    %c0_3 = arith.constant 0 : index
    %c0_4 = arith.constant 0 : index
    %c1 = arith.constant 1 : index
    %c0_5 = arith.constant 0 : index
    %2 = vector.load %arg3[%c0_3, %c0_4, %c1, %c0_5] : memref<1x1x20x128xf32, #tpu.memory_space<vmem>>, vector<1x1x18x128xf32>
    %3 = vector.shape_cast %2 : vector<1x1x18x128xf32> to vector<18x128xf32>
    %c0_6 = arith.constant 0 : index
    %c0_7 = arith.constant 0 : index
    %c2 = arith.constant 2 : index
    %c0_8 = arith.constant 0 : index
    %4 = vector.load %arg3[%c0_6, %c0_7, %c2, %c0_8] : memref<1x1x20x128xf32, #tpu.memory_space<vmem>>, vector<1x1x18x128xf32>
    %5 = vector.shape_cast %4 : vector<1x1x18x128xf32> to vector<18x128xf32>
    %c0_9 = arith.constant 0 : index
    %c0_10 = arith.constant 0 : index
    %c0_11 = arith.constant 0 : index
    %6 = vector.load %arg4[%c0_9, %c0_10, %c0_11] : memref<3x128x128xf32, #tpu.memory_space<vmem>>, vector<1x128x128xf32>
    %7 = vector.shape_cast %6 : vector<1x128x128xf32> to vector<128x128xf32>
    %cst = arith.constant dense<0.000000e+00> : vector<18x128xf32>
    %8 = tpu.matmul %1, %7, %cst {dimension_numbers = #tpu.dot_dimension_numbers<[1], [0], [0], [1], [0, 0, 1, 1], [], []>} : vector<18x128xf32>, vector<128x128xf32>, vector<18x128xf32> -> vector<18x128xf32>
    %c1_12 = arith.constant 1 : index
    %c0_13 = arith.constant 0 : index
    %c0_14 = arith.constant 0 : index
    %9 = vector.load %arg4[%c1_12, %c0_13, %c0_14] : memref<3x128x128xf32, #tpu.memory_space<vmem>>, vector<1x128x128xf32>
    %10 = vector.shape_cast %9 : vector<1x128x128xf32> to vector<128x128xf32>
    %cst_15 = arith.constant dense<0.000000e+00> : vector<18x128xf32>
    %11 = tpu.matmul %3, %10, %cst_15 {dimension_numbers = #tpu.dot_dimension_numbers<[1], [0], [0], [1], [0, 0, 1, 1], [], []>} : vector<18x128xf32>, vector<128x128xf32>, vector<18x128xf32> -> vector<18x128xf32>
    %12 = arith.addf %8, %11 : vector<18x128xf32>
    %c2_16 = arith.constant 2 : index
    %c0_17 = arith.constant 0 : index
    %c0_18 = arith.constant 0 : index
    %13 = vector.load %arg4[%c2_16, %c0_17, %c0_18] : memref<3x128x128xf32, #tpu.memory_space<vmem>>, vector<1x128x128xf32>
    %14 = vector.shape_cast %13 : vector<1x128x128xf32> to vector<128x128xf32>
    %cst_19 = arith.constant dense<0.000000e+00> : vector<18x128xf32>
    %15 = tpu.matmul %5, %14, %cst_19 {dimension_numbers = #tpu.dot_dimension_numbers<[1], [0], [0], [1], [0, 0, 1, 1], [], []>} : vector<18x128xf32>, vector<128x128xf32>, vector<18x128xf32> -> vector<18x128xf32>
    %16 = arith.addf %12, %15 : vector<18x128xf32>
    %c0_20 = arith.constant 0 : index
    %c0_21 = arith.constant 0 : index
    %17 = vector.load %arg5[%c0_20, %c0_21] : memref<1x128xf32, #tpu.memory_space<vmem>>, vector<1x128xf32>
    %18 = vector.broadcast %17 : vector<1x128xf32> to vector<18x128xf32>
    %19 = arith.addf %16, %18 : vector<18x128xf32>
    %cst_22 = arith.constant 0.000000e+00 : f32
    %20 = vector.broadcast %cst_22 : f32 to vector<18x128xf32>
    %21 = arith.maximumf %19, %20 : vector<18x128xf32>
    %22 = tpu.iota {dimensions = array<i32: 0>} : vector<18x1xi32>
    %c16_i32 = arith.constant 16 : i32
    %23 = arith.muli %arg1, %c16_i32 : i32
    %c1_i32 = arith.constant 1 : i32
    %24 = arith.subi %23, %c1_i32 : i32
    %25 = vector.broadcast %24 : i32 to vector<18x1xi32>
    %26 = arith.addi %25, %22 : vector<18x1xi32>
    %c0_i32 = arith.constant 0 : i32
    %27 = vector.broadcast %c0_i32 : i32 to vector<18x1xi32>
    %28 = arith.cmpi sge, %26, %27 : vector<18x1xi32>
    %c16_i32_23 = arith.constant 16 : i32
    %29 = vector.broadcast %c16_i32_23 : i32 to vector<18x1xi32>
    %30 = arith.cmpi slt, %26, %29 : vector<18x1xi32>
    %31 = arith.andi %28, %30 : vector<18x1xi1>
    %cst_24 = arith.constant 0.000000e+00 : f32
    %32 = vector.shape_cast %31 : vector<18x1xi1> to vector<18x1xi1>
    %33 = vector.broadcast %32 : vector<18x1xi1> to vector<18x128xi1>
    %34 = vector.broadcast %cst_24 : f32 to vector<18x128xf32>
    %35 = arith.select %33, %21, %34 : vector<18x128xi1>, vector<18x128xf32>
    %c0_25 = arith.constant 0 : index
    %c0_26 = arith.constant 0 : index
    %36 = vector.load %arg9[%c0_25, %c0_26] : memref<18x128xf32, #tpu.memory_space<vmem>>, vector<18x128xf32>
    tpu.vector_store %arg9[%c0_25, %c0_26], %35 {strides = array<i32>} : memref<18x128xf32, #tpu.memory_space<vmem>>, vector<18x128xf32>,
    %c0_27 = arith.constant 0 : index
    %c0_28 = arith.constant 0 : index
    %37 = vector.load %arg9[%c0_27, %c0_28] : memref<18x128xf32, #tpu.memory_space<vmem>>, vector<16x128xf32>
    %c0_29 = arith.constant 0 : index
    %c0_30 = arith.constant 0 : index
    %c0_31 = arith.constant 0 : index
    %38 = vector.load %arg6[%c0_29, %c0_30, %c0_31] : memref<3x128x128xf32, #tpu.memory_space<vmem>>, vector<1x128x128xf32>
    %39 = vector.shape_cast %38 : vector<1x128x128xf32> to vector<128x128xf32>
    %cst_32 = arith.constant dense<0.000000e+00> : vector<16x128xf32>
    %40 = tpu.matmul %37, %39, %cst_32 {dimension_numbers = #tpu.dot_dimension_numbers<[1], [0], [0], [1], [0, 0, 1, 1], [], []>} : vector<16x128xf32>, vector<128x128xf32>, vector<16x128xf32> -> vector<16x128xf32>
    %c1_33 = arith.constant 1 : index
    %c0_34 = arith.constant 0 : index
    %41 = vector.load %arg9[%c1_33, %c0_34] : memref<18x128xf32, #tpu.memory_space<vmem>>, vector<16x128xf32>
    %c1_35 = arith.constant 1 : index
    %c0_36 = arith.constant 0 : index
    %c0_37 = arith.constant 0 : index
    %42 = vector.load %arg6[%c1_35, %c0_36, %c0_37] : memref<3x128x128xf32, #tpu.memory_space<vmem>>, vector<1x128x128xf32>
    %43 = vector.shape_cast %42 : vector<1x128x128xf32> to vector<128x128xf32>
    %cst_38 = arith.constant dense<0.000000e+00> : vector<16x128xf32>
    %44 = tpu.matmul %41, %43, %cst_38 {dimension_numbers = #tpu.dot_dimension_numbers<[1], [0], [0], [1], [0, 0, 1, 1], [], []>} : vector<16x128xf32>, vector<128x128xf32>, vector<16x128xf32> -> vector<16x128xf32>
    %45 = arith.addf %40, %44 : vector<16x128xf32>
    %c2_39 = arith.constant 2 : index
    %c0_40 = arith.constant 0 : index
    %46 = vector.load %arg9[%c2_39, %c0_40] : memref<18x128xf32, #tpu.memory_space<vmem>>, vector<16x128xf32>
    %c2_41 = arith.constant 2 : index
    %c0_42 = arith.constant 0 : index
    %c0_43 = arith.constant 0 : index
    %47 = vector.load %arg6[%c2_41, %c0_42, %c0_43] : memref<3x128x128xf32, #tpu.memory_space<vmem>>, vector<1x128x128xf32>
    %48 = vector.shape_cast %47 : vector<1x128x128xf32> to vector<128x128xf32>
    %cst_44 = arith.constant dense<0.000000e+00> : vector<16x128xf32>
    %49 = tpu.matmul %46, %48, %cst_44 {dimension_numbers = #tpu.dot_dimension_numbers<[1], [0], [0], [1], [0, 0, 1, 1], [], []>} : vector<16x128xf32>, vector<128x128xf32>, vector<16x128xf32> -> vector<16x128xf32>
    %50 = arith.addf %45, %49 : vector<16x128xf32>
    %c0_45 = arith.constant 0 : index
    %c0_46 = arith.constant 0 : index
    %51 = vector.load %arg7[%c0_45, %c0_46] : memref<1x128xf32, #tpu.memory_space<vmem>>, vector<1x128xf32>
    %52 = vector.broadcast %51 : vector<1x128xf32> to vector<16x128xf32>
    %53 = arith.addf %50, %52 : vector<16x128xf32>
    %c0_47 = arith.constant 0 : index
    %c0_48 = arith.constant 0 : index
    %c0_49 = arith.constant 0 : index
    %54 = vector.load %arg8[%c0_47, %c0_48, %c0_49] : memref<1x16x128xf32, #tpu.memory_space<vmem>>, vector<1x16x128xf32>
    %55 = vector.shape_cast %54 : vector<1x16x128xf32> to vector<16x128xf32>
    %56 = vector.shape_cast %53 : vector<16x128xf32> to vector<1x16x128xf32>
    tpu.vector_store %arg8[%c0_47, %c0_48, %c0_49], %56 {strides = array<i32>} : memref<1x16x128xf32, #tpu.memory_space<vmem>>, vector<1x16x128xf32>,
    return
  }
  func.func @transform_0(%arg0: i32, %arg1: i32, %arg2: i32) -> (i32, i32, i32, i32) {
    %c0_i32 = arith.constant 0 : i32
    %c0_i32_0 = arith.constant 0 : i32
    %c0_i32_1 = arith.constant 0 : i32
    return %arg0, %arg1, %c0_i32, %c0_i32_0 : i32, i32, i32, i32
  }
  func.func @transform_1(%arg0: i32, %arg1: i32, %arg2: i32) -> (i32, i32, i32) {
    %c0_i32 = arith.constant 0 : i32
    %c0_i32_0 = arith.constant 0 : i32
    %c0_i32_1 = arith.constant 0 : i32
    return %c0_i32, %c0_i32_0, %arg2 : i32, i32, i32
  }
  func.func @transform_2(%arg0: i32, %arg1: i32, %arg2: i32) -> (i32, i32) {
    %c0_i32 = arith.constant 0 : i32
    %c0_i32_0 = arith.constant 0 : i32
    return %c0_i32, %arg2 : i32, i32
  }
  func.func @transform_3(%arg0: i32, %arg1: i32, %arg2: i32) -> (i32, i32, i32) {
    %c0_i32 = arith.constant 0 : i32
    %c0_i32_0 = arith.constant 0 : i32
    %c0_i32_1 = arith.constant 0 : i32
    return %c0_i32, %arg2, %c0_i32_0 : i32, i32, i32
  }
  func.func @transform_4(%arg0: i32, %arg1: i32, %arg2: i32) -> (i32, i32) {
    %c0_i32 = arith.constant 0 : i32
    %c0_i32_0 = arith.constant 0 : i32
    %c0_i32_1 = arith.constant 0 : i32
    return %c0_i32, %c0_i32_0 : i32, i32
  }
  func.func @transform_5(%arg0: i32, %arg1: i32, %arg2: i32) -> (i32, i32, i32) {
    %c0_i32 = arith.constant 0 : i32
    %c0_i32_0 = arith.constant 0 : i32
    return %arg0, %arg1, %c0_i32 : i32, i32, i32
  }
}

module attributes {stable_mosaic.version = 11 : i64} {
  func.func @_ffn_kernel(%arg0: i32, %arg1: i32, %arg2: i32, %arg3: memref<1x1x20x128xf32, #tpu.memory_space<vmem>>, %arg4: memref<3x128x128xf32, #tpu.memory_space<vmem>>, %arg5: memref<1x128xf32, #tpu.memory_space<vmem>>, %arg6: memref<3x128x128xf32, #tpu.memory_space<vmem>>, %arg7: memref<1x128xf32, #tpu.memory_space<vmem>>, %arg8: memref<1x16x128xf32, #tpu.memory_space<vmem>>, %arg9: memref<18x128xf32, #tpu.memory_space<vmem>>) attributes {dimension_semantics = [#tpu.dimension_semantics<parallel>, #tpu.dimension_semantics<parallel>, #tpu.dimension_semantics<arbitrary>], iteration_bounds = array<i64: 2, 1, 1>, scalar_prefetch = 0 : i64, scratch_operands = 1 : i64, tpu.core_type = #tpu.core_type<tc>, window_params = [{transform_indices = @transform_0, window_bounds = array<i64: 1, 1, 20, 128>}, {transform_indices = @transform_1, window_bounds = array<i64: 3, 128, 128>}, {transform_indices = @transform_2, window_bounds = array<i64: 1, 128>}, {transform_indices = @transform_3, window_bounds = array<i64: 3, 128, 128>}, {pipeline_mode = #tpu.pipeline_mode<synchronous>, transform_indices = @transform_4, window_bounds = array<i64: 1, 128>}, {transform_indices = @transform_5, window_bounds = array<i64: 1, 16, 128>}]} {
    %c0 = arith.constant 0 : index
    %c0_0 = arith.constant 0 : index
    %c0_1 = arith.constant 0 : index
    %c0_2 = arith.constant 0 : index
    %0 = vector.load %arg3[%c0, %c0_0, %c0_1, %c0_2] : memref<1x1x20x128xf32, #tpu.memory_space<vmem>>, vector<1x1x18x128xf32>
    %1 = vector.shape_cast %0 : vector<1x1x18x128xf32> to vector<18x128xf32>
    %c0_3 = arith.constant 0 : index
    %c0_4 = arith.constant 0 : index
    %c1 = arith.constant 1 : index
    %c0_5 = arith.constant 0 : index
    %2 = vector.load %arg3[%c0_3, %c0_4, %c1, %c0_5] : memref<1x1x20x128xf32, #tpu.memory_space<vmem>>, vector<1x1x18x128xf32>
    %3 = vector.shape_cast %2 : vector<1x1x18x128xf32> to vector<18x128xf32>
    %c0_6 = arith.constant 0 : index
    %c0_7 = arith.constant 0 : index
    %c2 = arith.constant 2 : index
    %c0_8 = arith.constant 0 : index
    %4 = vector.load %arg3[%c0_6, %c0_7, %c2, %c0_8] : memref<1x1x20x128xf32, #tpu.memory_space<vmem>>, vector<1x1x18x128xf32>
    %5 = vector.shape_cast %4 : vector<1x1x18x128xf32> to vector<18x128xf32>
    %c0_9 = arith.constant 0 : index
    %c0_10 = arith.constant 0 : index
    %c0_11 = arith.constant 0 : index
    %6 = vector.load %arg4[%c0_9, %c0_10, %c0_11] : memref<3x128x128xf32, #tpu.memory_space<vmem>>, vector<1x128x128xf32>
    %7 = vector.shape_cast %6 : vector<1x128x128xf32> to vector<128x128xf32>
    %cst = arith.constant dense<0.000000e+00> : vector<18x128xf32>
    %8 = tpu.matmul %1, %7, %cst {dimension_numbers = #tpu.dot_dimension_numbers<[1], [0], [0], [1], [0, 0, 1, 1], [], []>} : vector<18x128xf32>, vector<128x128xf32>, vector<18x128xf32> -> vector<18x128xf32>
    %c1_12 = arith.constant 1 : index
    %c0_13 = arith.constant 0 : index
    %c0_14 = arith.constant 0 : index
    %9 = vector.load %arg4[%c1_12, %c0_13, %c0_14] : memref<3x128x128xf32, #tpu.memory_space<vmem>>, vector<1x128x128xf32>
    %10 = vector.shape_cast %9 : vector<1x128x128xf32> to vector<128x128xf32>
    %cst_15 = arith.constant dense<0.000000e+00> : vector<18x128xf32>
    %11 = tpu.matmul %3, %10, %cst_15 {dimension_numbers = #tpu.dot_dimension_numbers<[1], [0], [0], [1], [0, 0, 1, 1], [], []>} : vector<18x128xf32>, vector<128x128xf32>, vector<18x128xf32> -> vector<18x128xf32>
    %12 = arith.addf %8, %11 : vector<18x128xf32>
    %c2_16 = arith.constant 2 : index
    %c0_17 = arith.constant 0 : index
    %c0_18 = arith.constant 0 : index
    %13 = vector.load %arg4[%c2_16, %c0_17, %c0_18] : memref<3x128x128xf32, #tpu.memory_space<vmem>>, vector<1x128x128xf32>
    %14 = vector.shape_cast %13 : vector<1x128x128xf32> to vector<128x128xf32>
    %cst_19 = arith.constant dense<0.000000e+00> : vector<18x128xf32>
    %15 = tpu.matmul %5, %14, %cst_19 {dimension_numbers = #tpu.dot_dimension_numbers<[1], [0], [0], [1], [0, 0, 1, 1], [], []>} : vector<18x128xf32>, vector<128x128xf32>, vector<18x128xf32> -> vector<18x128xf32>
    %16 = arith.addf %12, %15 : vector<18x128xf32>
    %c0_20 = arith.constant 0 : index
    %c0_21 = arith.constant 0 : index
    %17 = vector.load %arg5[%c0_20, %c0_21] : memref<1x128xf32, #tpu.memory_space<vmem>>, vector<1x128xf32>
    %18 = vector.broadcast %17 : vector<1x128xf32> to vector<18x128xf32>
    %19 = arith.addf %16, %18 : vector<18x128xf32>
    %cst_22 = arith.constant 0.000000e+00 : f32
    %20 = vector.broadcast %cst_22 : f32 to vector<18x128xf32>
    %21 = arith.maximumf %19, %20 : vector<18x128xf32>
    %22 = tpu.iota {dimensions = array<i32: 0>} : vector<18x1xi32>
    %c16_i32 = arith.constant 16 : i32
    %23 = arith.muli %arg1, %c16_i32 : i32
    %c1_i32 = arith.constant 1 : i32
    %24 = arith.subi %23, %c1_i32 : i32
    %25 = vector.broadcast %24 : i32 to vector<18x1xi32>
    %26 = arith.addi %25, %22 : vector<18x1xi32>
    %c0_i32 = arith.constant 0 : i32
    %27 = vector.broadcast %c0_i32 : i32 to vector<18x1xi32>
    %28 = arith.cmpi sge, %26, %27 : vector<18x1xi32>
    %c16_i32_23 = arith.constant 16 : i32
    %29 = vector.broadcast %c16_i32_23 : i32 to vector<18x1xi32>
    %30 = arith.cmpi slt, %26, %29 : vector<18x1xi32>
    %31 = arith.andi %28, %30 : vector<18x1xi1>
    %cst_24 = arith.constant 0.000000e+00 : f32
    %32 = vector.shape_cast %31 : vector<18x1xi1> to vector<18x1xi1>
    %33 = vector.broadcast %32 : vector<18x1xi1> to vector<18x128xi1>
    %34 = vector.broadcast %cst_24 : f32 to vector<18x128xf32>
    %35 = arith.select %33, %21, %34 : vector<18x128xi1>, vector<18x128xf32>
    %c0_25 = arith.constant 0 : index
    %c0_26 = arith.constant 0 : index
    %36 = vector.load %arg9[%c0_25, %c0_26] : memref<18x128xf32, #tpu.memory_space<vmem>>, vector<18x128xf32>
    tpu.vector_store %arg9[%c0_25, %c0_26], %35 {strides = array<i32>} : memref<18x128xf32, #tpu.memory_space<vmem>>, vector<18x128xf32>,
    %c0_27 = arith.constant 0 : index
    %c0_28 = arith.constant 0 : index
    %37 = vector.load %arg9[%c0_27, %c0_28] : memref<18x128xf32, #tpu.memory_space<vmem>>, vector<16x128xf32>
    %c0_29 = arith.constant 0 : index
    %c0_30 = arith.constant 0 : index
    %c0_31 = arith.constant 0 : index
    %38 = vector.load %arg6[%c0_29, %c0_30, %c0_31] : memref<3x128x128xf32, #tpu.memory_space<vmem>>, vector<1x128x128xf32>
    %39 = vector.shape_cast %38 : vector<1x128x128xf32> to vector<128x128xf32>
    %cst_32 = arith.constant dense<0.000000e+00> : vector<16x128xf32>
    %40 = tpu.matmul %37, %39, %cst_32 {dimension_numbers = #tpu.dot_dimension_numbers<[1], [0], [0], [1], [0, 0, 1, 1], [], []>} : vector<16x128xf32>, vector<128x128xf32>, vector<16x128xf32> -> vector<16x128xf32>
    %c1_33 = arith.constant 1 : index
    %c0_34 = arith.constant 0 : index
    %41 = vector.load %arg9[%c1_33, %c0_34] : memref<18x128xf32, #tpu.memory_space<vmem>>, vector<16x128xf32>
    %c1_35 = arith.constant 1 : index
    %c0_36 = arith.constant 0 : index
    %c0_37 = arith.constant 0 : index
    %42 = vector.load %arg6[%c1_35, %c0_36, %c0_37] : memref<3x128x128xf32, #tpu.memory_space<vmem>>, vector<1x128x128xf32>
    %43 = vector.shape_cast %42 : vector<1x128x128xf32> to vector<128x128xf32>
    %cst_38 = arith.constant dense<0.000000e+00> : vector<16x128xf32>
    %44 = tpu.matmul %41, %43, %cst_38 {dimension_numbers = #tpu.dot_dimension_numbers<[1], [0], [0], [1], [0, 0, 1, 1], [], []>} : vector<16x128xf32>, vector<128x128xf32>, vector<16x128xf32> -> vector<16x128xf32>
    %45 = arith.addf %40, %44 : vector<16x128xf32>
    %c2_39 = arith.constant 2 : index
    %c0_40 = arith.constant 0 : index
    %46 = vector.load %arg9[%c2_39, %c0_40] : memref<18x128xf32, #tpu.memory_space<vmem>>, vector<16x128xf32>
    %c2_41 = arith.constant 2 : index
    %c0_42 = arith.constant 0 : index
    %c0_43 = arith.constant 0 : index
    %47 = vector.load %arg6[%c2_41, %c0_42, %c0_43] : memref<3x128x128xf32, #tpu.memory_space<vmem>>, vector<1x128x128xf32>
    %48 = vector.shape_cast %47 : vector<1x128x128xf32> to vector<128x128xf32>
    %cst_44 = arith.constant dense<0.000000e+00> : vector<16x128xf32>
    %49 = tpu.matmul %46, %48, %cst_44 {dimension_numbers = #tpu.dot_dimension_numbers<[1], [0], [0], [1], [0, 0, 1, 1], [], []>} : vector<16x128xf32>, vector<128x128xf32>, vector<16x128xf32> -> vector<16x128xf32>
    %50 = arith.addf %45, %49 : vector<16x128xf32>
    %c0_45 = arith.constant 0 : index
    %c0_46 = arith.constant 0 : index
    %51 = vector.load %arg7[%c0_45, %c0_46] : memref<1x128xf32, #tpu.memory_space<vmem>>, vector<1x128xf32>
    %52 = vector.broadcast %51 : vector<1x128xf32> to vector<16x128xf32>
    %53 = arith.addf %50, %52 : vector<16x128xf32>
    %c0_47 = arith.constant 0 : index
    %c0_48 = arith.constant 0 : index
    %c0_49 = arith.constant 0 : index
    %54 = vector.load %arg8[%c0_47, %c0_48, %c0_49] : memref<1x16x128xf32, #tpu.memory_space<vmem>>, vector<1x16x128xf32>
    %55 = vector.shape_cast %54 : vector<1x16x128xf32> to vector<16x128xf32>
    %56 = vector.shape_cast %53 : vector<16x128xf32> to vector<1x16x128xf32>
    tpu.vector_store %arg8[%c0_47, %c0_48, %c0_49], %56 {strides = array<i32>} : memref<1x16x128xf32, #tpu.memory_space<vmem>>, vector<1x16x128xf32>,
    return
  }
  func.func @transform_0(%arg0: i32, %arg1: i32, %arg2: i32) -> (i32, i32, i32, i32) {
    %c0_i32 = arith.constant 0 : i32
    %c0_i32_0 = arith.constant 0 : i32
    %c0_i32_1 = arith.constant 0 : i32
    return %arg0, %arg1, %c0_i32, %c0_i32_0 : i32, i32, i32, i32
  }
  func.func @transform_1(%arg0: i32, %arg1: i32, %arg2: i32) -> (i32, i32, i32) {
    %c0_i32 = arith.constant 0 : i32
    %c0_i32_0 = arith.constant 0 : i32
    %c0_i32_1 = arith.constant 0 : i32
    return %c0_i32, %c0_i32_0, %arg2 : i32, i32, i32
  }
  func.func @transform_2(%arg0: i32, %arg1: i32, %arg2: i32) -> (i32, i32) {
    %c0_i32 = arith.constant 0 : i32
    %c0_i32_0 = arith.constant 0 : i32
    return %c0_i32, %arg2 : i32, i32
  }
  func.func @transform_3(%arg0: i32, %arg1: i32, %arg2: i32) -> (i32, i32, i32) {
    %c0_i32 = arith.constant 0 : i32
    %c0_i32_0 = arith.constant 0 : i32
    %c0_i32_1 = arith.constant 0 : i32
    return %c0_i32, %arg2, %c0_i32_0 : i32, i32, i32
  }
  func.func @transform_4(%arg0: i32, %arg1: i32, %arg2: i32) -> (i32, i32) {
    %c0_i32 = arith.constant 0 : i32
    %c0_i32_0 = arith.constant 0 : i32
    %c0_i32_1 = arith.constant 0 : i32
    return %c0_i32, %c0_i32_0 : i32, i32
  }
  func.func @transform_5(%arg0: i32, %arg1: i32, %arg2: i32) -> (i32, i32, i32) {
    %c0_i32 = arith.constant 0 : i32
    %c0_i32_0 = arith.constant 0 : i32
    return %arg0, %arg1, %c0_i32 : i32, i32, i32
  }
}

</mosaic_0001>

<bundles_post_ra>
// kernel: tpu_custom_call.1
= control target key start
LH: loop header
LB: loop body
LE: loop exit
PB: predicated region body
PF: predicated region fallthrough
CT: control target
= control target key end

     0   :  { %10 = vsyncpa [#allocation4], 0  ;;  %s1303_s0 = inlined_call_operand.vmem [shape: f32[2,1,20,128], index: 0, kind: input, shape index: {}]   ;;  %s1304_s1 = inlined_call_operand.hbm [shape: f32[3,128,128], index: 1, kind: input, shape index: {}]   ;;  %s1305_s2 = inlined_call_operand.vmem [shape: f32[1,128], index: 2, kind: input, shape index: {}]   ;;  %s1306_s3 = inlined_call_operand.hbm [shape: f32[3,128,128], index: 3, kind: input, shape index: {}]   ;;  %s1307_s4 = inlined_call_operand.vmem [shape: f32[1,128], index: 4, kind: input, shape index: {}]   ;;  %s1308_s5 = inlined_call_operand.hbm [shape: f32[2,16,128], index: 5, kind: output, shape index: {}]  }
   0x1   :  { %11 = vsyncpa [#allocation7], 0 }
   0x2   :  { %12 = vsyncpa [#allocation5], 0 }
   0x3   :  { %14 = vsyncpa [#allocation5 + $0x1], 0  ;;  %s1098_s18 = smov 0   ;;  %s1100_s19 = smov 0  }
   0x4   :  { %s1102_s20 = smov 0   ;;  %s1104_s21 = smov 0  }
   0x5   :  { %s1106_s22 = smov 0   ;;  %s1108_s23 = smov 0  }
   0x6 LB: > { %s780_s24 = sadd.s32 4294967295, %s1060_s23   ;;  %s781_s25 = sadd.s32 4294967294, %s1060_s23   ;;  %s1060_s23 = sphi %s1108_s23, %s20_s23   ;;  %s1056_s22 = sphi %s1106_s22, %s1317_s22   ;;  %s1052_s21 = sphi %s1104_s21, %s1316_s21   ;;  %s1048_s20 = sphi %s1102_s20, %s1315_s20   ;;  %s1044_s19 = sphi %s1100_s19, %s1314_s19   ;;  %s1040_s18 = sphi %s1098_s18, %s1313_s18  }
   0x7   : > { %s39_s26 = sadd.s32 1, %s1056_s22  ;;  %s175_s27 = sadd.s32 1, %s1048_s20 }
   0x8   : > { %p41_p0 = scmp.ge.s32.totalorder %s39_s26, 2  ;;  %p185_p1 = scmp.ne.s32.totalorder %s1048_s20, %s1044_s19 }
   0x9   : > { %p186_p2 = scmp.eq.s32.totalorder %s780_s24, 1  ;;  %p191_p3 = scmp.ne.s32.totalorder %s1044_s19, %s1040_s18 }
   0xa   : > { %s1319_s26 = smov (%p41_p0, %s39_s26), 0  ;;  %p192_p5 = scmp.eq.s32.totalorder %s781_s25, 1 }
   0xb   : > { %p1138_p4 = por %p186_p2, %p185_p1  ;;  %s170_s29 = ssub.s32 %s1056_s22, %s1319_s26 }
   0xc   : > { %p782_p6 = scmp.ge.s32.totalorder %s1060_s23, 1  ;;  %p173_p7 = scmp.eq.s32.totalorder %s170_s29, 0 }
   0xd   : > { %p1145_p8 = por %p192_p5, %p191_p3  ;;  %p199_p9 = scmp.lt.s32.totalorder %s1060_s23, 3 }
   0xe   : > { %s1151_s6 = scalar_select %p173_p7, %s1048_s20, %s175_s27  }
   0xf   : > { %p1153_p10 = pnand %p782_p6, %p199_p9  ;;  %p1157_p11 = scmp.eq.s32.totalorder %s780_s24, 0 }
  0x10   : > { %s212_s11 = sshll.u32 %s1304_s1, 4  ;;  %s1062_s12 = smov [#allocation3]   ;;  %s213_s11 = int_to_ptr.hbm [resolvable:$true] %s212_s11 }
  0x11   : > { %p841_p12 = pneg %p1153_p10  ;;  %s214_s13 = sshll.u32 %s1062_s12, 4  ;;  %s215_s13 = int_to_ptr.vmem [resolvable:$true] %s214_s13 }
  0x12   : > { %s235_s16 = sshll.u32 %s1306_s3, 4  ;;  %s1063_s17 = smov 128   ;;  %s236_s16 = int_to_ptr.hbm [resolvable:$true] %s235_s16 }
  0x13   : > { %p842_p13 = pnand %p1157_p11, %p841_p12  ;;  %s1064_s24 = smov 8  }
  0x14   : > { %s1065_s25 = smov [#allocation6]   ;;  %268 = sbr.rel (%p1153_p10) target bundleno = 373 (0x175), region = 40 }
  0x15   : > { %844 = dma.hbm_to_vmem [thread:$0]  (!%p842_p13), %s213_s11, 6144, %s215_s13, [#allocation4], %s1063_s17, %s1063_s17, %s1064_s24  }
  0x16   : > { %s237_s27 = sshll.u32 %s1065_s25, 4  ;;  %s238_s27 = int_to_ptr.vmem [resolvable:$true] %s237_s27 }
  0x17   : > { %847 = dma.hbm_to_vmem [thread:$0]  (!%p842_p13), %s236_s16, 6144, %s238_s27, [#allocation7], %s1063_s17, %s1063_s17, %s1064_s24  }
  0x19   : > { %1027 = dma.done.wait (%p1157_p11), [#allocation4], 6144  }
  0x1a   : > { %1029 = vsyncadd (%p1157_p11), [#allocation4], 4294961152 }
  0x1b   : > { %1031 = dma.done.wait (%p1157_p11), [#allocation7], 6144  }
  0x1c   : > { %1033 = vsyncadd (%p1157_p11), [#allocation7], 4294961152  ;;  %v433_v0 = vld [vmem:[#allocation3 + $0x178] sm:$0xff]  ;;  %v432_v1 = vld [vmem:[#allocation3 + $0x170] sm:$0xff]  ;;  %p309_p0 = scmp.lt.s32.totalorder %s1052_s21, 1  ;;  %s306_s13 = sand.u32 1, %s1044_s19  }
  0x1d   : > { %v364_v2 = vld [vmem:[#allocation3 + $0xf8] sm:$0xff]  ;;  %434 = vmatpush.msra.mxu2 %v433_v0  ;;  %v363_v4 = vld [vmem:[#allocation3 + $0xf0] sm:$0xff]  ;;  %v431_v5 = vld [vmem:[#allocation3 + $0x168] sm:$0xff]  ;;  %s790_s14 = sshll.u32 %s306_s13, 4  ;;  %s797_s24 = sshll.u32 %s1052_s21, 4 }
  0x1e   : > { %365 = vmatpush.msra.mxu0 %v364_v2  ;;  %v347_v3 = vld [vmem:[#allocation3 + $0x78] sm:$0xff]  ;;  %v346_v6 = vld [vmem:[#allocation3 + $0x70] sm:$0xff]  ;;  %v362_v7 = vld [vmem:[#allocation3 + $0xe8] sm:$0xff]  ;;  %s1183_s29 = scalar_select %p309_p0, %s1052_s21, 1 }
  0x1f   : > { %391 = vmatpush.msra.mxu1 %v347_v3  ;;  %435 = vmatpush.msra.mxu2 %v432_v1  ;;  %v345_v8 = vld [vmem:[#allocation3 + $0x68] sm:$0xff]  ;;  %v430_v9 = vld [vmem:[#allocation3 + $0x160] sm:$0xff]  ;;  %v429_v12 = vld [vmem:[#allocation3 + $0x158] sm:$0xff]  ;;  %s308_s17 = scalar_lea.vmem [#allocation8], %s790_s14  ;;  %s640_s9 = scalar_lea.sflag [#allocation5], %s306_s13 }
  0x20   : > { %366 = vmatpush.msra.mxu0 %v363_v4  ;;  %v361_v10 = vld [vmem:[#allocation3 + $0xe0] sm:$0xff]  ;;  %v360_v13 = vld [vmem:[#allocation3 + $0xd8] sm:$0xff]  ;;  %v428_v15 = vld [vmem:[#allocation3 + $0x150] sm:$0xff]  ;;  %s830_s7 = smul.u32 24, %s1183_s29  ;;  %s653_s29 = scalar_lea.hbm %s1308_s5, %s797_s24 }
  0x21   : > { %392 = vmatpush.msra.mxu1 %v346_v6  ;;  %436 = vmatpush.msra.mxu2 %v431_v5  ;;  %v344_v11 = vld [vmem:[#allocation3 + $0x60] sm:$0xff]  ;;  %v343_v14 = vld [vmem:[#allocation3 + $0x58] sm:$0xff]  ;;  %v359_v16 = vld [vmem:[#allocation3 + $0xd0] sm:$0xff]  ;;  %s656_s8 = sshll.u32 %s653_s29, 4  ;;  %s994_s14 = scalar_lea.hbm %s1308_s5, 32  ;;  %s657_s8 = int_to_ptr.hbm [resolvable:$true] %s656_s8 }
  0x22   : > { %367 = vmatpush.msra.mxu0 %v362_v7  ;;  %v342_v17 = vld [vmem:[#allocation3 + $0x50] sm:$0xff]  ;;  %v427_v18 = vld [vmem:[#allocation3 + $0x148] sm:$0xff]  ;;  %v426_v21 = vld [vmem:[#allocation3 + $0x140] sm:$0xff]  ;;  %s1189_s10 = scalar_lea.vmem %s1303_s0, %s830_s7  ;;  %s654_s7 = sshll.u32 %s308_s17, 4  ;;  %s655_s7 = int_to_ptr.vmem [resolvable:$true] %s654_s7 }
  0x23   : > { %393 = vmatpush.msra.mxu1 %v345_v8  ;;  %437 = vmatpush.msra.mxu2 %v430_v9  ;;  %v358_v19 = vld [vmem:[#allocation3 + $0xc8] sm:$0xff]  ;;  %v357_v22 = vld [vmem:[#allocation3 + $0xc0] sm:$0xff]  ;;  %v425_v24 = vld [vmem:[#allocation3 + $0x138] sm:$0xff] }
  0x24   : > { %368 = vmatpush.msra.mxu0 %v361_v10  ;;  %v341_v20 = vld [vmem:[#allocation3 + $0x48] sm:$0xff]  ;;  %v340_v23 = vld [vmem:[#allocation3 + $0x40] sm:$0xff]  ;;  %v356_v25 = vld [vmem:[#allocation3 + $0xb8] sm:$0xff] }
  0x25   : > { %394 = vmatpush.msra.mxu1 %v344_v11  ;;  %438 = vmatpush.msra.mxu2 %v429_v12  ;;  %v339_v26 = vld [vmem:[#allocation3 + $0x38] sm:$0xff]  ;;  %v424_v27 = vld [vmem:[#allocation3 + $0x130] sm:$0xff]  ;;  %v423_v30 = vld [vmem:[#allocation3 + $0x128] sm:$0xff] }
  0x26   : > { %369 = vmatpush.msra.mxu0 %v360_v13  ;;  %v355_v28 = vld [vmem:[#allocation3 + $0xb0] sm:$0xff]  ;;  %v354_v31 = vld [vmem:[#allocation3 + $0xa8] sm:$0xff]  ;;  %v540_v33 = vld [vmem:[#allocation6 + $0xf8] sm:$0xff] }
  0x27   : > { %395 = vmatpush.msra.mxu1 %v343_v14  ;;  %439 = vmatpush.msra.mxu2 %v428_v15  ;;  %v338_v29 = vld [vmem:[#allocation3 + $0x30] sm:$0xff]  ;;  %v337_v32 = vld [vmem:[#allocation3 + $0x28] sm:$0xff]  ;;  %v422_v35 = vld [vmem:[#allocation3 + $0x120] sm:$0xff] }
  0x28   : > { %370 = vmatpush.msra.mxu0 %v359_v16  ;;  %v539_v34 = vld [vmem:[#allocation6 + $0xf0] sm:$0xff]  ;;  %v353_v36 = vld [vmem:[#allocation3 + $0xa0] sm:$0xff]  ;;  %541 = vmatpush.msra.mxu3 %v540_v33  ;;  %v538_v38 = vld [vmem:[#allocation6 + $0xe8] sm:$0xff] }
  0x29   : > { %396 = vmatpush.msra.mxu1 %v342_v17  ;;  %440 = vmatpush.msra.mxu2 %v427_v18  ;;  %v336_v37 = vld [vmem:[#allocation3 + $0x20] sm:$0xff]  ;;  %v421_v39 = vld [vmem:[#allocation3 + $0x118] sm:$0xff]  ;;  %v420_v43 = vld [vmem:[#allocation3 + $0x110] sm:$0xff] }
  0x2a   : > { %371 = vmatpush.msra.mxu0 %v358_v19  ;;  %v352_v40 = vld [vmem:[#allocation3 + $0x98] sm:$0xff]  ;;  %542 = vmatpush.msra.mxu3 %v539_v34  ;;  %v537_v42 = vld [vmem:[#allocation6 + $0xe0] sm:$0xff]  ;;  %v351_v44 = vld [vmem:[#allocation3 + $0x90] sm:$0xff] }
  0x2b   : > { %397 = vmatpush.msra.mxu1 %v341_v20  ;;  %441 = vmatpush.msra.mxu2 %v426_v21  ;;  %v335_v41 = vld [vmem:[#allocation3 + $0x18] sm:$0xff]  ;;  %v334_v45 = vld [vmem:[#allocation3 + $0x10] sm:$0xff]  ;;  %v419_v47 = vld [vmem:[#allocation3 + $0x108] sm:$0xff] }
  0x2c   : > { %372 = vmatpush.msra.mxu0 %v357_v22  ;;  %543 = vmatpush.msra.mxu3 %v538_v38  ;;  %v536_v46 = vld [vmem:[#allocation6 + $0xd8] sm:$0xff]  ;;  %v350_v48 = vld [vmem:[#allocation3 + $0x88] sm:$0xff]  ;;  %v535_v50 = vld [vmem:[#allocation6 + $0xd0] sm:$0xff] }
  0x2d   : > { %398 = vmatpush.msra.mxu1 %v340_v23  ;;  %442 = vmatpush.msra.mxu2 %v425_v24  ;;  %v333_v49 = vld [vmem:[#allocation3 + $0x8] sm:$0xff]  ;;  %v418_v51 = vld [vmem:[#allocation3 + $0x100] sm:$0xff]  ;;  %v1194_v57 = vld [vmem:[#allocation6 + $0x78] sm:$0xff] }
  0x2e   : > { %373 = vmatpush.msra.mxu0 %v356_v25  ;;  %544 = vmatpush.msra.mxu3 %v537_v42  ;;  %v349_v52 = vld [vmem:[#allocation3 + $0x80] sm:$0xff]  ;;  %v329_v53 = vld [vmem:[%s1189_s10 + $0x2] sm:$0xff]  ;;  %v605_v59 = vld [vmem:[#allocation6 + $0x178] sm:$0xff] }
  0x2f   : > { %399 = vmatpush.msra.mxu1 %v339_v26  ;;  %443 = vmatpush.msra.mxu2 %v424_v27  ;;  %v332_v54 = vld [vmem:[#allocation3] sm:$0xff]  ;;  %v326_v55 = vld [vmem:[%s1189_s10 + $0x1] sm:$0xff]  ;;  %v532_v0 = vld [vmem:[#allocation6 + $0xb8] sm:$0xff] }
  0x30   : > { %374 = vmatpush.msra.mxu0 %v355_v28  ;;  %545 = vmatpush.msra.mxu3 %v536_v46  ;;  %v323_v56 = vld [vmem:[%s1189_s10] sm:$0xff]  ;;  %v1196_v60 = vld [vmem:[#allocation6 + $0x70] sm:$0xff]  ;;  %v533_v61 = vld [vmem:[#allocation6 + $0xc0] sm:$0xff] }
  0x31   : > { %400 = vmatpush.msra.mxu1 %v338_v29  ;;  %444 = vmatpush.msra.mxu2 %v423_v30  ;;  %v534_v58 = vld [vmem:[#allocation6 + $0xc8] sm:$0xff]  ;;  %v604_v62 = vld [vmem:[#allocation6 + $0x170] sm:$0xff]  ;;  %v1203_v3 = vld [vmem:[#allocation6 + $0x60] sm:$0xff] }
  0x32   : > { %375 = vmatpush.msra.mxu0 %v354_v31  ;;  %546 = vmatpush.msra.mxu3 %v535_v50  ;;  %v1199_v63 = vld [vmem:[#allocation6 + $0x68] sm:$0xff]  ;;  %v330_v2 = vld [vmem:[%s1189_s10 + $0xa] sm:$0xff]  ;;  %v331_v10 = vld [vmem:[%s1189_s10 + $0x12] sm:$0x3] }
  0x33   : > { %401 = vmatpush.msra.mxu1 %v337_v32  ;;  %445 = vmatpush.msra.mxu2 %v422_v35  ;;  %v603_v1 = vld [vmem:[#allocation6 + $0x168] sm:$0xff]  ;;  %v327_v4 = vld [vmem:[%s1189_s10 + $0x9] sm:$0xff]  ;;  %v328_v11 = vld [vmem:[%s1189_s10 + $0x11] sm:$0x3] }
  0x34   : > { %376 = vmatpush.msra.mxu0 %v353_v36  ;;  %547 = vmatpush.msra.mxu3 %v534_v58  ;;  %v324_v5 = vld [vmem:[%s1189_s10 + $0x8] sm:$0xff]  ;;  %v1208_v6 = vld [vmem:[#allocation6 + $0x58] sm:$0xff]  ;;  %v1214_v9 = vld [vmem:[#allocation6 + $0x48] sm:$0xff] }
  0x35   : > { %402 = vmatpush.msra.mxu1 %v336_v37  ;;  %446 = vmatpush.msra.mxu2 %v421_v39  ;;  %v531_v7 = vld [vmem:[#allocation6 + $0xb0] sm:$0xff]  ;;  %v325_v12 = vld [vmem:[%s1189_s10 + $0x10] sm:$0x3]  ;;  %v1221_v13 = vld [vmem:[#allocation6 + $0x40] sm:$0xff]  ;;  %s988_s10 = sshra.s32 %s657_s8, 4  ;;  %s989_s10 = int_to_ptr.hbm [resolvable:$true] %s988_s10 }
  0x36   : > { %377 = vmatpush.msra.mxu0 %v352_v40  ;;  %548 = vmatpush.msra.mxu3 %v533_v61  ;;  %v1211_v8 = vld [vmem:[#allocation6 + $0x50] sm:$0xff]  ;;  %v1224_v14 = vld [vmem:[#allocation6 + $0x38] sm:$0xff]  ;;  %v530_v16 = vld [vmem:[#allocation6 + $0xa8] sm:$0xff]  ;;  %s990_s11 = scalar_lea.hbm %s989_s10, 16  ;;  %p995_p5 = scmp.lt.s32.totalorder %s989_s10, %s1308_s5 }
  0x37   : > { %403 = vmatpush.msra.mxu1 %v335_v41  ;;  %447 = vmatpush.msra.mxu2 %v420_v43  ;;  %v1227_v15 = vld [vmem:[#allocation6 + $0x30] sm:$0xff]  ;;  %v602_v17 = vld [vmem:[#allocation6 + $0x160] sm:$0xff]  ;;  %v1230_v18 = vld [vmem:[#allocation6 + $0x28] sm:$0xff]  ;;  %v473_v41 = vlaneseq  ;;  %p991_p1 = scmp.ne.s32.totalorder %s989_s10, %s990_s11  ;;  %p996_p6 = scmp.lt.s32.totalorder %s994_s14, %s990_s11 }
  0x38   : > { %378 = vmatpush.msra.mxu0 %v351_v44  ;;  %549 = vmatpush.msra.mxu3 %v532_v0  ;;  %v1233_v19 = vld [vmem:[#allocation6 + $0x20] sm:$0xff]  ;;  %v601_v21 = vld [vmem:[#allocation6 + $0x158] sm:$0xff]  ;;  %v600_v24 = vld [vmem:[#allocation6 + $0x150] sm:$0xff] }
  0x39   : > { %404 = vmatpush.msra.mxu1 %v334_v45  ;;  %448 = vmatpush.msra.mxu2 %v419_v47  ;;  %v529_v20 = vld [vmem:[#allocation6 + $0xa0] sm:$0xff]  ;;  %v1235_v22 = vld [vmem:[#allocation6 + $0x18] sm:$0xff]  ;;  %v1238_v25 = vld [vmem:[#allocation6 + $0x10] sm:$0xff]  ;;  %v474_v44 = vshrl.u32 %v473_v41, 7  ;;  %p992_p2 = pnand %p991_p1, %p1138_p4  ;;  %p997_p7 = por %p996_p6, %p995_p5 }
  0x3a   : > { %379 = vmatpush.msra.mxu0 %v350_v48  ;;  %550 = vmatpush.msra.mxu3 %v531_v7  ;;  %v528_v23 = vld [vmem:[#allocation6 + $0x98] sm:$0xff]  ;;  %v527_v26 = vld [vmem:[#allocation6 + $0x90] sm:$0xff]  ;;  %v599_v27 = vld [vmem:[#allocation6 + $0x148] sm:$0xff] }
  0x3b   : > { %405 = vmatpush.msra.mxu1 %v333_v49  ;;  %449 = vmatpush.msra.mxu2 %v418_v51  ;;  %v1241_v28 = vld [vmem:[#allocation6 + $0x8] sm:$0xff]  ;;  %v598_v30 = vld [vmem:[#allocation6 + $0x140] sm:$0xff]  ;;  %v597_v33 = vld [vmem:[#allocation6 + $0x138] sm:$0xff]  ;;  %v480_v48 = vadd.s32 4294967295, %v474_v44  ;;  %v476_v61 = vadd.s32 16, %v474_v44  ;;  %p993_p3 = pneg %p992_p2 }
  0x3c   : > { %380 = vmatpush.msra.mxu0 %v349_v52  ;;  %450 = vmatmul.f32.vlgmr.msra.gmra.mxu2 %v329_v53  ;;  %v526_v29 = vld [vmem:[#allocation6 + $0x88] sm:$0xff]  ;;  %v506_v31 = vld [vmem:[#allocation6] sm:$0xff]  ;;  %v596_v34 = vld [vmem:[#allocation6 + $0x130] sm:$0xff] }
  0x3d   : > { %406 = vmatpush.msra.mxu1 %v332_v54  ;;  %381 = vmatmul.f32.vlgmr.msra.gmra.mxu0 %v326_v55  ;;  %v525_v32 = vld [vmem:[#allocation6 + $0x80] sm:$0xff]  ;;  %v595_v35 = vld [vmem:[#allocation6 + $0x128] sm:$0xff]  ;;  %v593_v37 = vld [vmem:[#allocation6 + $0x118] sm:$0xff]  ;;  %vm483_vm0 = vcmp.ge.s32.totalorder %v480_v48, 0  ;;  %p998_p9 = pnand %p997_p7, %p993_p3 }
  0x3e   : > { %407 = vmatmul.f32.vlgmr.msra.gmra.mxu1 %v323_v56  ;;  %564 = vmatpush.msrb.mxu0 %v1194_v57  ;;  %v594_v36 = vld [vmem:[#allocation6 + $0x120] sm:$0xff]  ;;  %v592_v38 = vld [vmem:[#allocation6 + $0x110] sm:$0xff]  ;;  %v591_v39 = vld [vmem:[#allocation6 + $0x108] sm:$0xff] }
  0x3f   : > { %606 = vmatpush.msrb.mxu1 %v605_v59  ;;  %814 = vmatpush.msrb.mxu2 %v605_v59  ;;  %v590_v40 = vld [vmem:[#allocation6 + $0x100] sm:$0xff]  ;;  %v911_v46 = vld [vmem:[%s1305_s2] ss:$0 sm:$0xff] }
  0x40   : > { %565 = vmatpush.msrb.mxu0 %v1196_v60  ;;  %551 = vmatpush.msra.mxu3 %v530_v16 }
  0x41   : > { %607 = vmatpush.msrb.mxu1 %v604_v62  ;;  %815 = vmatpush.msrb.mxu2 %v604_v62 }
  0x42   : > { %566 = vmatpush.msrb.mxu0 %v1199_v63  ;;  %552 = vmatpush.msra.mxu3 %v529_v20 }
  0x43   : > { %608 = vmatpush.msrb.mxu1 %v603_v1  ;;  %816 = vmatpush.msrb.mxu2 %v603_v1  ;;  %v482_v1 = vadd.s32 4294967295, %v476_v61 }
  0x44   : > { %453 = vmatmul.f32.gmra.mxu2 %v330_v2  ;;  %567 = vmatpush.msrb.mxu0 %v1203_v3 }
  0x45   : > { %384 = vmatmul.f32.gmra.mxu0 %v327_v4  ;;  %609 = vmatpush.msrb.mxu1 %v602_v17  ;;  %vm488_vm1 = vcmp.lt.s32.totalorder %v482_v1, 16 }
  0x46   : > { %410 = vmatmul.f32.gmra.mxu1 %v324_v5  ;;  %568 = vmatpush.msrb.mxu0 %v1208_v6 }
  0x47   : > { %817 = vmatpush.msrb.mxu2 %v602_v17  ;;  %610 = vmatpush.msrb.mxu1 %v601_v21 }
  0x48   : > { %569 = vmatpush.msrb.mxu0 %v1211_v8  ;;  %553 = vmatpush.msra.mxu3 %v528_v23 }
  0x49   : > { %818 = vmatpush.msrb.mxu2 %v601_v21  ;;  %611 = vmatpush.msrb.mxu1 %v600_v24 }
  0x4a   : > { %570 = vmatpush.msrb.mxu0 %v1214_v9  ;;  %554 = vmatpush.msra.mxu3 %v527_v26 }
  0x4b   : > { %819 = vmatpush.msrb.mxu2 %v600_v24  ;;  %612 = vmatpush.msrb.mxu1 %v599_v27 }
  0x4c   : > { %456 = vmatmul.f32.gmra.mxu2 %v331_v10  ;;  %571 = vmatpush.msrb.mxu0 %v1221_v13 }
  0x4d   : > { %387 = vmatmul.f32.gmra.mxu0 %v328_v11  ;;  %820 = vmatpush.msrb.mxu2 %v599_v27 }
  0x4e   : > { %413 = vmatmul.f32.gmra.mxu1 %v325_v12  ;;  %572 = vmatpush.msrb.mxu0 %v1224_v14 }
  0x4f   : > { %555 = vmatpush.msra.mxu3 %v526_v29  ;;  %613 = vmatpush.msrb.mxu1 %v598_v30 }
  0x50   : > { %573 = vmatpush.msrb.mxu0 %v1227_v15  ;;  %821 = vmatpush.msrb.mxu2 %v598_v30 }
  0x51   : > { %556 = vmatpush.msra.mxu3 %v525_v32  ;;  %614 = vmatpush.msrb.mxu1 %v597_v33 }
  0x52   : > { %574 = vmatpush.msrb.mxu0 %v1230_v18  ;;  %822 = vmatpush.msrb.mxu2 %v597_v33 }
  0x53   : > { %798 = vmatpush.msrb.mxu3 %v1194_v57  ;;  %615 = vmatpush.msrb.mxu1 %v596_v34 }
  0x54   : > { %575 = vmatpush.msrb.mxu0 %v1233_v19  ;;  %823 = vmatpush.msrb.mxu2 %v596_v34 }
  0x55   : > { %799 = vmatpush.msrb.mxu3 %v1196_v60  ;;  %616 = vmatpush.msrb.mxu1 %v595_v35 }
  0x56   : > { %576 = vmatpush.msrb.mxu0 %v1235_v22  ;;  %824 = vmatpush.msrb.mxu2 %v595_v35 }
  0x57   : > { %800 = vmatpush.msrb.mxu3 %v1199_v63  ;;  %617 = vmatpush.msrb.mxu1 %v594_v36 }
  0x58   : > { %577 = vmatpush.msrb.mxu0 %v1238_v25  ;;  %825 = vmatpush.msrb.mxu2 %v594_v36 }
  0x59   : > { %801 = vmatpush.msrb.mxu3 %v1203_v3  ;;  %618 = vmatpush.msrb.mxu1 %v593_v37 }
  0x5a   : > { %578 = vmatpush.msrb.mxu0 %v1241_v28  ;;  %826 = vmatpush.msrb.mxu2 %v593_v37 }
  0x5b   : > { %802 = vmatpush.msrb.mxu3 %v1208_v6  ;;  %619 = vmatpush.msrb.mxu1 %v592_v38 }
  0x5c   : > { %579 = vmatpush.msrb.mxu0 %v506_v31  ;;  %827 = vmatpush.msrb.mxu2 %v592_v38 }
  0x5d   : > { %803 = vmatpush.msrb.mxu3 %v1211_v8  ;;  %620 = vmatpush.msrb.mxu1 %v591_v39 }
  0x5e   : > { %828 = vmatpush.msrb.mxu2 %v591_v39 }
  0x5f   : > { %804 = vmatpush.msrb.mxu3 %v1214_v9  ;;  %621 = vmatpush.msrb.mxu1 %v590_v40 }
  0x60   : > { %829 = vmatpush.msrb.mxu2 %v590_v40 }
  0x61   : > { %805 = vmatpush.msrb.mxu3 %v1221_v13  ;;  %v912_v13 = vld [vmem:[%s1307_s4] ss:$0 sm:$0xff] }
  0x63   : > { %806 = vmatpush.msrb.mxu3 %v1224_v14 }
  0x65   : > { %807 = vmatpush.msrb.mxu3 %v1227_v15 }
  0x67   : > { %808 = vmatpush.msrb.mxu3 %v1230_v18 }
  0x69   : > { %809 = vmatpush.msrb.mxu3 %v1233_v19 }
  0x6b   : > { %810 = vmatpush.msrb.mxu3 %v1235_v22 }
  0x6d   : > { %811 = vmatpush.msrb.mxu3 %v1238_v25 }
  0x6f   : > { %812 = vmatpush.msrb.mxu3 %v1241_v28 }
  0x71   : > { %813 = vmatpush.msrb.mxu3 %v506_v31 }
  0xba   : > { %v382_v42 = vpop.f32.mrf.mxu0 }
  0xbb   : > { %v408_v43 = vpop.f32.mrf.mxu1 }
  0xbc   : > { %v409_v45 = vadd.f32 %v408_v43, %v382_v42 }
  0xbf   : > { %v451_v47 = vpop.f32.mrf.mxu2 }
  0xc0   : > { %v460_v49 = vadd.f32 %v451_v47, %v409_v45 }
  0xc2   : > { %v467_v50 = vadd.f32 %v911_v46, %v460_v49  ;;  %v385_v51 = vpop.f32.mrf.mxu0 }
  0xc3   : > { %v411_v52 = vpop.f32.mrf.mxu1 }
  0xc4   : > { %v470_v53 = vmax.f32 %v467_v50, 0.0  ;;  %v412_v54 = vadd.f32 %v411_v52, %v385_v51 }
  0xc6   : > { %v498_v55 = vsel %vm483_vm0, %v470_v53, 0.0  ;;  %913 = vmatmul.msk.f32.vlgmr.msrb.gmra.mxu0 %vm483_vm0, %v470_v53 }
  0xc7   : > { %501 = vst [vmem:[#allocation2] sm:$0xff] %v498_v55  ;;  %v454_v56 = vpop.f32.mrf.mxu2 }
  0xc8   : > { %v461_v57 = vadd.f32 %v454_v56, %v412_v54 }
  0xca   : > { %v468_v58 = vadd.f32 %v911_v46, %v461_v57  ;;  %v388_v59 = vpop.f32.mrf.mxu0 }
  0xcb   : > { %v414_v60 = vpop.f32.mrf.mxu1 }
  0xcc   : > { %v471_v62 = vmax.f32 %v468_v58, 0.0  ;;  %v415_v63 = vadd.f32 %v414_v60, %v388_v59 }
  0xce   : > { %502 = vst [vmem:[#allocation2 + $0x8] sm:$0xff] %v471_v62 }
  0xcf   : > { %v457_v0 = vpop.f32.mrf.mxu2 }
  0xd0   : > { %v462_v2 = vadd.f32 %v457_v0, %v415_v63 }
  0xd2   : > { %v469_v3 = vadd.f32 %v911_v46, %v462_v2 }
  0xd4   : > { %v472_v4 = vmax.f32 %v469_v3, 0.0 }
  0xd5   : > { %v522_v5 = vld [vmem:[#allocation2 + $0x1] sm:$0xff] }
  0xd6   : > { %v587_v6 = vld [vmem:[#allocation2 + $0x2] sm:$0xff]  ;;  %v500_v7 = vsel %vm488_vm1, %v472_v4, 0.0  ;;  %557 = vmatmul.f32.vlgmr.msra.gmra.mxu3 %v522_v5 }
  0xd7   : > { %622 = vmatmul.f32.vlgmr.msrb.gmra.mxu1 %v587_v6  ;;  %503 = vst [vmem:[#allocation2 + $0x10] sm:$0x3] %v500_v7 }
  0xde   : > { %v523_v8 = vld [vmem:[#allocation2 + $0x9] sm:$0xff] }
  0xdf   : > { %v588_v9 = vld [vmem:[#allocation2 + $0xa] sm:$0xff]  ;;  %560 = vmatmul.f32.gmra.mxu3 %v523_v8 }
  0xe0   : > { %625 = vmatmul.f32.vlgmr.msrb.gmra.mxu2 %v588_v9 }
  0xe7   : > { %583 = vmatmul.f32.vlgmr.msrb.gmra.mxu3 %v471_v62 }
 0x143   : > { %v581_v10 = vpop.f32.mrf.mxu0 }
 0x154   : > { %v623_v14 = vpop.f32.mrf.mxu1 }
 0x159   : > { %v558_v11 = vpop.f32.mrf.mxu3 }
 0x15a   : > { %v582_v12 = vadd.f32 %v581_v10, %v558_v11 }
 0x15c   : > { %v629_v15 = vadd.f32 %v623_v14, %v582_v12 }
 0x15e   : > { %v635_v16 = vadd.f32 %v912_v13, %v629_v15 }
 0x160   : > { %637 = vst [vmem:[%s308_s17] sm:$0xff] %v635_v16 }
 0x162   : > { %v561_v17 = vpop.f32.mrf.mxu3 }
 0x163   : > { %v626_v20 = vpop.f32.mrf.mxu2 }
 0x16a   : > { %v584_v18 = vpop.f32.mrf.mxu3 }
 0x16b   : > { %v585_v19 = vadd.f32 %v584_v18, %v561_v17 }
 0x16d   : > { %v630_v21 = vadd.f32 %v626_v20, %v585_v19 }
 0x16f   : > { %v636_v22 = vadd.f32 %v912_v13, %v630_v21 }
 0x171   : > { %638 = vst [vmem:[%s308_s17 + $0x8] sm:$0xff] %v636_v22 }
 0x172   : > { %1001 = shalt.err (!%p998_p9)
}
 0x173   : > { %s1066_s13 = smov 128   ;;  %s1067_s17 = smov 8  }
 0x174   : > { %839 = dma.vmem_to_hbm [thread:$0]  (%p1138_p4), %s655_s7, 256, %s657_s8, %s640_s9, %s1066_s13, %s1066_s13, %s1067_s17  }
 0x175 PF: > { %p856_p10 = scmp.ge.s32.totalorder %s1060_s23, 2  ;;  %s671_s24 = sand.u32 1, %s1040_s18  }
 0x176   : > { %s672_s25 = scalar_lea.sflag [#allocation5], %s671_s24 }
 0x177   : > { %p849_p11 = pnand %p856_p10, %p1145_p8 }
 0x179   : > { %p850_p12 = pneg %p849_p11 }
 0x17b   : > { %1035 = dma.done.wait (%p850_p12), %s672_s25, 256  }
 0x17c   : > { %1037 = vsyncadd (%p850_p12), %s672_s25, 4294967040  ;;  %s20_s23 = sadd.s32 1, %s1060_s23   ;;  %s1313_s18 = smov %s1044_s19 }
 0x17d   : > { %p17_p13 = scmp.ge.s32.totalorder %s20_s23, 4   ;;  %s1314_s19 = smov %s1048_s20 }
 0x17e   : > { %s1315_s20 = smov %s1151_s6  ;;  %s1316_s21 = smov %s1056_s22 }
 0x17f   : > { %s1317_s22 = smov %s1319_s26  ;;  %19 = sbr.rel (!%p17_p13) target bundleno = 6 (0x6), region = 93 }
 0x184   :  { %678 = vsyncpa [#allocation4], 1 }
 0x185   :  { %680 = vsyncpa [#allocation4 + $0x1], 1 }
 0x186   :  { %681 = vsyncpa [#allocation7], 1 }
 0x187   :  { %682 = vsyncpa [#allocation5], 1 }
 0x188   :  { %684 = vsyncpa [#allocation5 + $0x1], 1 }

// kernel: tpu_custom_call.1
= control target key start
LH: loop header
LB: loop body
LE: loop exit
PB: predicated region body
PF: predicated region fallthrough
CT: control target
= control target key end

     0   :  { %10 = vsyncpa [#allocation4], 0  ;;  %s1303_s0 = inlined_call_operand.vmem [shape: f32[2,1,20,128], index: 0, kind: input, shape index: {}]   ;;  %s1304_s1 = inlined_call_operand.hbm [shape: f32[3,128,128], index: 1, kind: input, shape index: {}]   ;;  %s1305_s2 = inlined_call_operand.vmem [shape: f32[1,128], index: 2, kind: input, shape index: {}]   ;;  %s1306_s3 = inlined_call_operand.hbm [shape: f32[3,128,128], index: 3, kind: input, shape index: {}]   ;;  %s1307_s4 = inlined_call_operand.vmem [shape: f32[1,128], index: 4, kind: input, shape index: {}]   ;;  %s1308_s5 = inlined_call_operand.hbm [shape: f32[2,16,128], index: 5, kind: output, shape index: {}]  }
   0x1   :  { %11 = vsyncpa [#allocation7], 0 }
   0x2   :  { %12 = vsyncpa [#allocation5], 0 }
   0x3   :  { %14 = vsyncpa [#allocation5 + $0x1], 0  ;;  %s1098_s18 = smov 0   ;;  %s1100_s19 = smov 0  }
   0x4   :  { %s1102_s20 = smov 0   ;;  %s1104_s21 = smov 0  }
   0x5   :  { %s1106_s22 = smov 0   ;;  %s1108_s23 = smov 0  }
   0x6 LB: > { %s780_s24 = sadd.s32 4294967295, %s1060_s23   ;;  %s781_s25 = sadd.s32 4294967294, %s1060_s23   ;;  %s1060_s23 = sphi %s1108_s23, %s20_s23   ;;  %s1056_s22 = sphi %s1106_s22, %s1317_s22   ;;  %s1052_s21 = sphi %s1104_s21, %s1316_s21   ;;  %s1048_s20 = sphi %s1102_s20, %s1315_s20   ;;  %s1044_s19 = sphi %s1100_s19, %s1314_s19   ;;  %s1040_s18 = sphi %s1098_s18, %s1313_s18  }
   0x7   : > { %s39_s26 = sadd.s32 1, %s1056_s22  ;;  %s175_s27 = sadd.s32 1, %s1048_s20 }
   0x8   : > { %p41_p0 = scmp.ge.s32.totalorder %s39_s26, 2  ;;  %p185_p1 = scmp.ne.s32.totalorder %s1048_s20, %s1044_s19 }
   0x9   : > { %p186_p2 = scmp.eq.s32.totalorder %s780_s24, 1  ;;  %p191_p3 = scmp.ne.s32.totalorder %s1044_s19, %s1040_s18 }
   0xa   : > { %s1319_s26 = smov (%p41_p0, %s39_s26), 0  ;;  %p192_p5 = scmp.eq.s32.totalorder %s781_s25, 1 }
   0xb   : > { %p1138_p4 = por %p186_p2, %p185_p1  ;;  %s170_s29 = ssub.s32 %s1056_s22, %s1319_s26 }
   0xc   : > { %p782_p6 = scmp.ge.s32.totalorder %s1060_s23, 1  ;;  %p173_p7 = scmp.eq.s32.totalorder %s170_s29, 0 }
   0xd   : > { %p1145_p8 = por %p192_p5, %p191_p3  ;;  %p199_p9 = scmp.lt.s32.totalorder %s1060_s23, 3 }
   0xe   : > { %s1151_s6 = scalar_select %p173_p7, %s1048_s20, %s175_s27  }
   0xf   : > { %p1153_p10 = pnand %p782_p6, %p199_p9  ;;  %p1157_p11 = scmp.eq.s32.totalorder %s780_s24, 0 }
  0x10   : > { %s212_s11 = sshll.u32 %s1304_s1, 4  ;;  %s1062_s12 = smov [#allocation3]   ;;  %s213_s11 = int_to_ptr.hbm [resolvable:$true] %s212_s11 }
  0x11   : > { %p841_p12 = pneg %p1153_p10  ;;  %s214_s13 = sshll.u32 %s1062_s12, 4  ;;  %s215_s13 = int_to_ptr.vmem [resolvable:$true] %s214_s13 }
  0x12   : > { %s235_s16 = sshll.u32 %s1306_s3, 4  ;;  %s1063_s17 = smov 128   ;;  %s236_s16 = int_to_ptr.hbm [resolvable:$true] %s235_s16 }
  0x13   : > { %p842_p13 = pnand %p1157_p11, %p841_p12  ;;  %s1064_s24 = smov 8  }
  0x14   : > { %s1065_s25 = smov [#allocation6]   ;;  %268 = sbr.rel (%p1153_p10) target bundleno = 373 (0x175), region = 40 }
  0x15   : > { %844 = dma.hbm_to_vmem [thread:$0]  (!%p842_p13), %s213_s11, 6144, %s215_s13, [#allocation4], %s1063_s17, %s1063_s17, %s1064_s24  }
  0x16   : > { %s237_s27 = sshll.u32 %s1065_s25, 4  ;;  %s238_s27 = int_to_ptr.vmem [resolvable:$true] %s237_s27 }
  0x17   : > { %847 = dma.hbm_to_vmem [thread:$0]  (!%p842_p13), %s236_s16, 6144, %s238_s27, [#allocation7], %s1063_s17, %s1063_s17, %s1064_s24  }
  0x19   : > { %1027 = dma.done.wait (%p1157_p11), [#allocation4], 6144  }
  0x1a   : > { %1029 = vsyncadd (%p1157_p11), [#allocation4], 4294961152 }
  0x1b   : > { %1031 = dma.done.wait (%p1157_p11), [#allocation7], 6144  }
  0x1c   : > { %1033 = vsyncadd (%p1157_p11), [#allocation7], 4294961152  ;;  %v433_v0 = vld [vmem:[#allocation3 + $0x178] sm:$0xff]  ;;  %v432_v1 = vld [vmem:[#allocation3 + $0x170] sm:$0xff]  ;;  %p309_p0 = scmp.lt.s32.totalorder %s1052_s21, 1  ;;  %s306_s13 = sand.u32 1, %s1044_s19  }
  0x1d   : > { %v364_v2 = vld [vmem:[#allocation3 + $0xf8] sm:$0xff]  ;;  %434 = vmatpush.msra.mxu2 %v433_v0  ;;  %v363_v4 = vld [vmem:[#allocation3 + $0xf0] sm:$0xff]  ;;  %v431_v5 = vld [vmem:[#allocation3 + $0x168] sm:$0xff]  ;;  %s790_s14 = sshll.u32 %s306_s13, 4  ;;  %s797_s24 = sshll.u32 %s1052_s21, 4 }
  0x1e   : > { %365 = vmatpush.msra.mxu0 %v364_v2  ;;  %v347_v3 = vld [vmem:[#allocation3 + $0x78] sm:$0xff]  ;;  %v346_v6 = vld [vmem:[#allocation3 + $0x70] sm:$0xff]  ;;  %v362_v7 = vld [vmem:[#allocation3 + $0xe8] sm:$0xff]  ;;  %s1183_s29 = scalar_select %p309_p0, %s1052_s21, 1 }
  0x1f   : > { %391 = vmatpush.msra.mxu1 %v347_v3  ;;  %435 = vmatpush.msra.mxu2 %v432_v1  ;;  %v345_v8 = vld [vmem:[#allocation3 + $0x68] sm:$0xff]  ;;  %v430_v9 = vld [vmem:[#allocation3 + $0x160] sm:$0xff]  ;;  %v429_v12 = vld [vmem:[#allocation3 + $0x158] sm:$0xff]  ;;  %s308_s17 = scalar_lea.vmem [#allocation8], %s790_s14  ;;  %s640_s9 = scalar_lea.sflag [#allocation5], %s306_s13 }
  0x20   : > { %366 = vmatpush.msra.mxu0 %v363_v4  ;;  %v361_v10 = vld [vmem:[#allocation3 + $0xe0] sm:$0xff]  ;;  %v360_v13 = vld [vmem:[#allocation3 + $0xd8] sm:$0xff]  ;;  %v428_v15 = vld [vmem:[#allocation3 + $0x150] sm:$0xff]  ;;  %s830_s7 = smul.u32 24, %s1183_s29  ;;  %s653_s29 = scalar_lea.hbm %s1308_s5, %s797_s24 }
  0x21   : > { %392 = vmatpush.msra.mxu1 %v346_v6  ;;  %436 = vmatpush.msra.mxu2 %v431_v5  ;;  %v344_v11 = vld [vmem:[#allocation3 + $0x60] sm:$0xff]  ;;  %v343_v14 = vld [vmem:[#allocation3 + $0x58] sm:$0xff]  ;;  %v359_v16 = vld [vmem:[#allocation3 + $0xd0] sm:$0xff]  ;;  %s656_s8 = sshll.u32 %s653_s29, 4  ;;  %s994_s14 = scalar_lea.hbm %s1308_s5, 32  ;;  %s657_s8 = int_to_ptr.hbm [resolvable:$true] %s656_s8 }
  0x22   : > { %367 = vmatpush.msra.mxu0 %v362_v7  ;;  %v342_v17 = vld [vmem:[#allocation3 + $0x50] sm:$0xff]  ;;  %v427_v18 = vld [vmem:[#allocation3 + $0x148] sm:$0xff]  ;;  %v426_v21 = vld [vmem:[#allocation3 + $0x140] sm:$0xff]  ;;  %s1189_s10 = scalar_lea.vmem %s1303_s0, %s830_s7  ;;  %s654_s7 = sshll.u32 %s308_s17, 4  ;;  %s655_s7 = int_to_ptr.vmem [resolvable:$true] %s654_s7 }
  0x23   : > { %393 = vmatpush.msra.mxu1 %v345_v8  ;;  %437 = vmatpush.msra.mxu2 %v430_v9  ;;  %v358_v19 = vld [vmem:[#allocation3 + $0xc8] sm:$0xff]  ;;  %v357_v22 = vld [vmem:[#allocation3 + $0xc0] sm:$0xff]  ;;  %v425_v24 = vld [vmem:[#allocation3 + $0x138] sm:$0xff] }
  0x24   : > { %368 = vmatpush.msra.mxu0 %v361_v10  ;;  %v341_v20 = vld [vmem:[#allocation3 + $0x48] sm:$0xff]  ;;  %v340_v23 = vld [vmem:[#allocation3 + $0x40] sm:$0xff]  ;;  %v356_v25 = vld [vmem:[#allocation3 + $0xb8] sm:$0xff] }
  0x25   : > { %394 = vmatpush.msra.mxu1 %v344_v11  ;;  %438 = vmatpush.msra.mxu2 %v429_v12  ;;  %v339_v26 = vld [vmem:[#allocation3 + $0x38] sm:$0xff]  ;;  %v424_v27 = vld [vmem:[#allocation3 + $0x130] sm:$0xff]  ;;  %v423_v30 = vld [vmem:[#allocation3 + $0x128] sm:$0xff] }
  0x26   : > { %369 = vmatpush.msra.mxu0 %v360_v13  ;;  %v355_v28 = vld [vmem:[#allocation3 + $0xb0] sm:$0xff]  ;;  %v354_v31 = vld [vmem:[#allocation3 + $0xa8] sm:$0xff]  ;;  %v540_v33 = vld [vmem:[#allocation6 + $0xf8] sm:$0xff] }
  0x27   : > { %395 = vmatpush.msra.mxu1 %v343_v14  ;;  %439 = vmatpush.msra.mxu2 %v428_v15  ;;  %v338_v29 = vld [vmem:[#allocation3 + $0x30] sm:$0xff]  ;;  %v337_v32 = vld [vmem:[#allocation3 + $0x28] sm:$0xff]  ;;  %v422_v35 = vld [vmem:[#allocation3 + $0x120] sm:$0xff] }
  0x28   : > { %370 = vmatpush.msra.mxu0 %v359_v16  ;;  %v539_v34 = vld [vmem:[#allocation6 + $0xf0] sm:$0xff]  ;;  %v353_v36 = vld [vmem:[#allocation3 + $0xa0] sm:$0xff]  ;;  %541 = vmatpush.msra.mxu3 %v540_v33  ;;  %v538_v38 = vld [vmem:[#allocation6 + $0xe8] sm:$0xff] }
  0x29   : > { %396 = vmatpush.msra.mxu1 %v342_v17  ;;  %440 = vmatpush.msra.mxu2 %v427_v18  ;;  %v336_v37 = vld [vmem:[#allocation3 + $0x20] sm:$0xff]  ;;  %v421_v39 = vld [vmem:[#allocation3 + $0x118] sm:$0xff]  ;;  %v420_v43 = vld [vmem:[#allocation3 + $0x110] sm:$0xff] }
  0x2a   : > { %371 = vmatpush.msra.mxu0 %v358_v19  ;;  %v352_v40 = vld [vmem:[#allocation3 + $0x98] sm:$0xff]  ;;  %542 = vmatpush.msra.mxu3 %v539_v34  ;;  %v537_v42 = vld [vmem:[#allocation6 + $0xe0] sm:$0xff]  ;;  %v351_v44 = vld [vmem:[#allocation3 + $0x90] sm:$0xff] }
  0x2b   : > { %397 = vmatpush.msra.mxu1 %v341_v20  ;;  %441 = vmatpush.msra.mxu2 %v426_v21  ;;  %v335_v41 = vld [vmem:[#allocation3 + $0x18] sm:$0xff]  ;;  %v334_v45 = vld [vmem:[#allocation3 + $0x10] sm:$0xff]  ;;  %v419_v47 = vld [vmem:[#allocation3 + $0x108] sm:$0xff] }
  0x2c   : > { %372 = vmatpush.msra.mxu0 %v357_v22  ;;  %543 = vmatpush.msra.mxu3 %v538_v38  ;;  %v536_v46 = vld [vmem:[#allocation6 + $0xd8] sm:$0xff]  ;;  %v350_v48 = vld [vmem:[#allocation3 + $0x88] sm:$0xff]  ;;  %v535_v50 = vld [vmem:[#allocation6 + $0xd0] sm:$0xff] }
  0x2d   : > { %398 = vmatpush.msra.mxu1 %v340_v23  ;;  %442 = vmatpush.msra.mxu2 %v425_v24  ;;  %v333_v49 = vld [vmem:[#allocation3 + $0x8] sm:$0xff]  ;;  %v418_v51 = vld [vmem:[#allocation3 + $0x100] sm:$0xff]  ;;  %v1194_v57 = vld [vmem:[#allocation6 + $0x78] sm:$0xff] }
  0x2e   : > { %373 = vmatpush.msra.mxu0 %v356_v25  ;;  %544 = vmatpush.msra.mxu3 %v537_v42  ;;  %v349_v52 = vld [vmem:[#allocation3 + $0x80] sm:$0xff]  ;;  %v329_v53 = vld [vmem:[%s1189_s10 + $0x2] sm:$0xff]  ;;  %v605_v59 = vld [vmem:[#allocation6 + $0x178] sm:$0xff] }
  0x2f   : > { %399 = vmatpush.msra.mxu1 %v339_v26  ;;  %443 = vmatpush.msra.mxu2 %v424_v27  ;;  %v332_v54 = vld [vmem:[#allocation3] sm:$0xff]  ;;  %v326_v55 = vld [vmem:[%s1189_s10 + $0x1] sm:$0xff]  ;;  %v532_v0 = vld [vmem:[#allocation6 + $0xb8] sm:$0xff] }
  0x30   : > { %374 = vmatpush.msra.mxu0 %v355_v28  ;;  %545 = vmatpush.msra.mxu3 %v536_v46  ;;  %v323_v56 = vld [vmem:[%s1189_s10] sm:$0xff]  ;;  %v1196_v60 = vld [vmem:[#allocation6 + $0x70] sm:$0xff]  ;;  %v533_v61 = vld [vmem:[#allocation6 + $0xc0] sm:$0xff] }
  0x31   : > { %400 = vmatpush.msra.mxu1 %v338_v29  ;;  %444 = vmatpush.msra.mxu2 %v423_v30  ;;  %v534_v58 = vld [vmem:[#allocation6 + $0xc8] sm:$0xff]  ;;  %v604_v62 = vld [vmem:[#allocation6 + $0x170] sm:$0xff]  ;;  %v1203_v3 = vld [vmem:[#allocation6 + $0x60] sm:$0xff] }
  0x32   : > { %375 = vmatpush.msra.mxu0 %v354_v31  ;;  %546 = vmatpush.msra.mxu3 %v535_v50  ;;  %v1199_v63 = vld [vmem:[#allocation6 + $0x68] sm:$0xff]  ;;  %v330_v2 = vld [vmem:[%s1189_s10 + $0xa] sm:$0xff]  ;;  %v331_v10 = vld [vmem:[%s1189_s10 + $0x12] sm:$0x3] }
  0x33   : > { %401 = vmatpush.msra.mxu1 %v337_v32  ;;  %445 = vmatpush.msra.mxu2 %v422_v35  ;;  %v603_v1 = vld [vmem:[#allocation6 + $0x168] sm:$0xff]  ;;  %v327_v4 = vld [vmem:[%s1189_s10 + $0x9] sm:$0xff]  ;;  %v328_v11 = vld [vmem:[%s1189_s10 + $0x11] sm:$0x3] }
  0x34   : > { %376 = vmatpush.msra.mxu0 %v353_v36  ;;  %547 = vmatpush.msra.mxu3 %v534_v58  ;;  %v324_v5 = vld [vmem:[%s1189_s10 + $0x8] sm:$0xff]  ;;  %v1208_v6 = vld [vmem:[#allocation6 + $0x58] sm:$0xff]  ;;  %v1214_v9 = vld [vmem:[#allocation6 + $0x48] sm:$0xff] }
  0x35   : > { %402 = vmatpush.msra.mxu1 %v336_v37  ;;  %446 = vmatpush.msra.mxu2 %v421_v39  ;;  %v531_v7 = vld [vmem:[#allocation6 + $0xb0] sm:$0xff]  ;;  %v325_v12 = vld [vmem:[%s1189_s10 + $0x10] sm:$0x3]  ;;  %v1221_v13 = vld [vmem:[#allocation6 + $0x40] sm:$0xff]  ;;  %s988_s10 = sshra.s32 %s657_s8, 4  ;;  %s989_s10 = int_to_ptr.hbm [resolvable:$true] %s988_s10 }
  0x36   : > { %377 = vmatpush.msra.mxu0 %v352_v40  ;;  %548 = vmatpush.msra.mxu3 %v533_v61  ;;  %v1211_v8 = vld [vmem:[#allocation6 + $0x50] sm:$0xff]  ;;  %v1224_v14 = vld [vmem:[#allocation6 + $0x38] sm:$0xff]  ;;  %v530_v16 = vld [vmem:[#allocation6 + $0xa8] sm:$0xff]  ;;  %s990_s11 = scalar_lea.hbm %s989_s10, 16  ;;  %p995_p5 = scmp.lt.s32.totalorder %s989_s10, %s1308_s5 }
  0x37   : > { %403 = vmatpush.msra.mxu1 %v335_v41  ;;  %447 = vmatpush.msra.mxu2 %v420_v43  ;;  %v1227_v15 = vld [vmem:[#allocation6 + $0x30] sm:$0xff]  ;;  %v602_v17 = vld [vmem:[#allocation6 + $0x160] sm:$0xff]  ;;  %v1230_v18 = vld [vmem:[#allocation6 + $0x28] sm:$0xff]  ;;  %v473_v41 = vlaneseq  ;;  %p991_p1 = scmp.ne.s32.totalorder %s989_s10, %s990_s11  ;;  %p996_p6 = scmp.lt.s32.totalorder %s994_s14, %s990_s11 }
  0x38   : > { %378 = vmatpush.msra.mxu0 %v351_v44  ;;  %549 = vmatpush.msra.mxu3 %v532_v0  ;;  %v1233_v19 = vld [vmem:[#allocation6 + $0x20] sm:$0xff]  ;;  %v601_v21 = vld [vmem:[#allocation6 + $0x158] sm:$0xff]  ;;  %v600_v24 = vld [vmem:[#allocation6 + $0x150] sm:$0xff] }
  0x39   : > { %404 = vmatpush.msra.mxu1 %v334_v45  ;;  %448 = vmatpush.msra.mxu2 %v419_v47  ;;  %v529_v20 = vld [vmem:[#allocation6 + $0xa0] sm:$0xff]  ;;  %v1235_v22 = vld [vmem:[#allocation6 + $0x18] sm:$0xff]  ;;  %v1238_v25 = vld [vmem:[#allocation6 + $0x10] sm:$0xff]  ;;  %v474_v44 = vshrl.u32 %v473_v41, 7  ;;  %p992_p2 = pnand %p991_p1, %p1138_p4  ;;  %p997_p7 = por %p996_p6, %p995_p5 }
  0x3a   : > { %379 = vmatpush.msra.mxu0 %v350_v48  ;;  %550 = vmatpush.msra.mxu3 %v531_v7  ;;  %v528_v23 = vld [vmem:[#allocation6 + $0x98] sm:$0xff]  ;;  %v527_v26 = vld [vmem:[#allocation6 + $0x90] sm:$0xff]  ;;  %v599_v27 = vld [vmem:[#allocation6 + $0x148] sm:$0xff] }
  0x3b   : > { %405 = vmatpush.msra.mxu1 %v333_v49  ;;  %449 = vmatpush.msra.mxu2 %v418_v51  ;;  %v1241_v28 = vld [vmem:[#allocation6 + $0x8] sm:$0xff]  ;;  %v598_v30 = vld [vmem:[#allocation6 + $0x140] sm:$0xff]  ;;  %v597_v33 = vld [vmem:[#allocation6 + $0x138] sm:$0xff]  ;;  %v480_v48 = vadd.s32 4294967295, %v474_v44  ;;  %v476_v61 = vadd.s32 16, %v474_v44  ;;  %p993_p3 = pneg %p992_p2 }
  0x3c   : > { %380 = vmatpush.msra.mxu0 %v349_v52  ;;  %450 = vmatmul.f32.vlgmr.msra.gmra.mxu2 %v329_v53  ;;  %v526_v29 = vld [vmem:[#allocation6 + $0x88] sm:$0xff]  ;;  %v506_v31 = vld [vmem:[#allocation6] sm:$0xff]  ;;  %v596_v34 = vld [vmem:[#allocation6 + $0x130] sm:$0xff] }
  0x3d   : > { %406 = vmatpush.msra.mxu1 %v332_v54  ;;  %381 = vmatmul.f32.vlgmr.msra.gmra.mxu0 %v326_v55  ;;  %v525_v32 = vld [vmem:[#allocation6 + $0x80] sm:$0xff]  ;;  %v595_v35 = vld [vmem:[#allocation6 + $0x128] sm:$0xff]  ;;  %v593_v37 = vld [vmem:[#allocation6 + $0x118] sm:$0xff]  ;;  %vm483_vm0 = vcmp.ge.s32.totalorder %v480_v48, 0  ;;  %p998_p9 = pnand %p997_p7, %p993_p3 }
  0x3e   : > { %407 = vmatmul.f32.vlgmr.msra.gmra.mxu1 %v323_v56  ;;  %564 = vmatpush.msrb.mxu0 %v1194_v57  ;;  %v594_v36 = vld [vmem:[#allocation6 + $0x120] sm:$0xff]  ;;  %v592_v38 = vld [vmem:[#allocation6 + $0x110] sm:$0xff]  ;;  %v591_v39 = vld [vmem:[#allocation6 + $0x108] sm:$0xff] }
  0x3f   : > { %606 = vmatpush.msrb.mxu1 %v605_v59  ;;  %814 = vmatpush.msrb.mxu2 %v605_v59  ;;  %v590_v40 = vld [vmem:[#allocation6 + $0x100] sm:$0xff]  ;;  %v911_v46 = vld [vmem:[%s1305_s2] ss:$0 sm:$0xff] }
  0x40   : > { %565 = vmatpush.msrb.mxu0 %v1196_v60  ;;  %551 = vmatpush.msra.mxu3 %v530_v16 }
  0x41   : > { %607 = vmatpush.msrb.mxu1 %v604_v62  ;;  %815 = vmatpush.msrb.mxu2 %v604_v62 }
  0x42   : > { %566 = vmatpush.msrb.mxu0 %v1199_v63  ;;  %552 = vmatpush.msra.mxu3 %v529_v20 }
  0x43   : > { %608 = vmatpush.msrb.mxu1 %v603_v1  ;;  %816 = vmatpush.msrb.mxu2 %v603_v1  ;;  %v482_v1 = vadd.s32 4294967295, %v476_v61 }
  0x44   : > { %453 = vmatmul.f32.gmra.mxu2 %v330_v2  ;;  %567 = vmatpush.msrb.mxu0 %v1203_v3 }
  0x45   : > { %384 = vmatmul.f32.gmra.mxu0 %v327_v4  ;;  %609 = vmatpush.msrb.mxu1 %v602_v17  ;;  %vm488_vm1 = vcmp.lt.s32.totalorder %v482_v1, 16 }
  0x46   : > { %410 = vmatmul.f32.gmra.mxu1 %v324_v5  ;;  %568 = vmatpush.msrb.mxu0 %v1208_v6 }
  0x47   : > { %817 = vmatpush.msrb.mxu2 %v602_v17  ;;  %610 = vmatpush.msrb.mxu1 %v601_v21 }
  0x48   : > { %569 = vmatpush.msrb.mxu0 %v1211_v8  ;;  %553 = vmatpush.msra.mxu3 %v528_v23 }
  0x49   : > { %818 = vmatpush.msrb.mxu2 %v601_v21  ;;  %611 = vmatpush.msrb.mxu1 %v600_v24 }
  0x4a   : > { %570 = vmatpush.msrb.mxu0 %v1214_v9  ;;  %554 = vmatpush.msra.mxu3 %v527_v26 }
  0x4b   : > { %819 = vmatpush.msrb.mxu2 %v600_v24  ;;  %612 = vmatpush.msrb.mxu1 %v599_v27 }
  0x4c   : > { %456 = vmatmul.f32.gmra.mxu2 %v331_v10  ;;  %571 = vmatpush.msrb.mxu0 %v1221_v13 }
  0x4d   : > { %387 = vmatmul.f32.gmra.mxu0 %v328_v11  ;;  %820 = vmatpush.msrb.mxu2 %v599_v27 }
  0x4e   : > { %413 = vmatmul.f32.gmra.mxu1 %v325_v12  ;;  %572 = vmatpush.msrb.mxu0 %v1224_v14 }
  0x4f   : > { %555 = vmatpush.msra.mxu3 %v526_v29  ;;  %613 = vmatpush.msrb.mxu1 %v598_v30 }
  0x50   : > { %573 = vmatpush.msrb.mxu0 %v1227_v15  ;;  %821 = vmatpush.msrb.mxu2 %v598_v30 }
  0x51   : > { %556 = vmatpush.msra.mxu3 %v525_v32  ;;  %614 = vmatpush.msrb.mxu1 %v597_v33 }
  0x52   : > { %574 = vmatpush.msrb.mxu0 %v1230_v18  ;;  %822 = vmatpush.msrb.mxu2 %v597_v33 }
  0x53   : > { %798 = vmatpush.msrb.mxu3 %v1194_v57  ;;  %615 = vmatpush.msrb.mxu1 %v596_v34 }
  0x54   : > { %575 = vmatpush.msrb.mxu0 %v1233_v19  ;;  %823 = vmatpush.msrb.mxu2 %v596_v34 }
  0x55   : > { %799 = vmatpush.msrb.mxu3 %v1196_v60  ;;  %616 = vmatpush.msrb.mxu1 %v595_v35 }
  0x56   : > { %576 = vmatpush.msrb.mxu0 %v1235_v22  ;;  %824 = vmatpush.msrb.mxu2 %v595_v35 }
  0x57   : > { %800 = vmatpush.msrb.mxu3 %v1199_v63  ;;  %617 = vmatpush.msrb.mxu1 %v594_v36 }
  0x58   : > { %577 = vmatpush.msrb.mxu0 %v1238_v25  ;;  %825 = vmatpush.msrb.mxu2 %v594_v36 }
  0x59   : > { %801 = vmatpush.msrb.mxu3 %v1203_v3  ;;  %618 = vmatpush.msrb.mxu1 %v593_v37 }
  0x5a   : > { %578 = vmatpush.msrb.mxu0 %v1241_v28  ;;  %826 = vmatpush.msrb.mxu2 %v593_v37 }
  0x5b   : > { %802 = vmatpush.msrb.mxu3 %v1208_v6  ;;  %619 = vmatpush.msrb.mxu1 %v592_v38 }
  0x5c   : > { %579 = vmatpush.msrb.mxu0 %v506_v31  ;;  %827 = vmatpush.msrb.mxu2 %v592_v38 }
  0x5d   : > { %803 = vmatpush.msrb.mxu3 %v1211_v8  ;;  %620 = vmatpush.msrb.mxu1 %v591_v39 }
  0x5e   : > { %828 = vmatpush.msrb.mxu2 %v591_v39 }
  0x5f   : > { %804 = vmatpush.msrb.mxu3 %v1214_v9  ;;  %621 = vmatpush.msrb.mxu1 %v590_v40 }
  0x60   : > { %829 = vmatpush.msrb.mxu2 %v590_v40 }
  0x61   : > { %805 = vmatpush.msrb.mxu3 %v1221_v13  ;;  %v912_v13 = vld [vmem:[%s1307_s4] ss:$0 sm:$0xff] }
  0x63   : > { %806 = vmatpush.msrb.mxu3 %v1224_v14 }
  0x65   : > { %807 = vmatpush.msrb.mxu3 %v1227_v15 }
  0x67   : > { %808 = vmatpush.msrb.mxu3 %v1230_v18 }
  0x69   : > { %809 = vmatpush.msrb.mxu3 %v1233_v19 }
  0x6b   : > { %810 = vmatpush.msrb.mxu3 %v1235_v22 }
  0x6d   : > { %811 = vmatpush.msrb.mxu3 %v1238_v25 }
  0x6f   : > { %812 = vmatpush.msrb.mxu3 %v1241_v28 }
  0x71   : > { %813 = vmatpush.msrb.mxu3 %v506_v31 }
  0xba   : > { %v382_v42 = vpop.f32.mrf.mxu0 }
  0xbb   : > { %v408_v43 = vpop.f32.mrf.mxu1 }
  0xbc   : > { %v409_v45 = vadd.f32 %v408_v43, %v382_v42 }
  0xbf   : > { %v451_v47 = vpop.f32.mrf.mxu2 }
  0xc0   : > { %v460_v49 = vadd.f32 %v451_v47, %v409_v45 }
  0xc2   : > { %v467_v50 = vadd.f32 %v911_v46, %v460_v49  ;;  %v385_v51 = vpop.f32.mrf.mxu0 }
  0xc3   : > { %v411_v52 = vpop.f32.mrf.mxu1 }
  0xc4   : > { %v470_v53 = vmax.f32 %v467_v50, 0.0  ;;  %v412_v54 = vadd.f32 %v411_v52, %v385_v51 }
  0xc6   : > { %v498_v55 = vsel %vm483_vm0, %v470_v53, 0.0  ;;  %913 = vmatmul.msk.f32.vlgmr.msrb.gmra.mxu0 %vm483_vm0, %v470_v53 }
  0xc7   : > { %501 = vst [vmem:[#allocation2] sm:$0xff] %v498_v55  ;;  %v454_v56 = vpop.f32.mrf.mxu2 }
  0xc8   : > { %v461_v57 = vadd.f32 %v454_v56, %v412_v54 }
  0xca   : > { %v468_v58 = vadd.f32 %v911_v46, %v461_v57  ;;  %v388_v59 = vpop.f32.mrf.mxu0 }
  0xcb   : > { %v414_v60 = vpop.f32.mrf.mxu1 }
  0xcc   : > { %v471_v62 = vmax.f32 %v468_v58, 0.0  ;;  %v415_v63 = vadd.f32 %v414_v60, %v388_v59 }
  0xce   : > { %502 = vst [vmem:[#allocation2 + $0x8] sm:$0xff] %v471_v62 }
  0xcf   : > { %v457_v0 = vpop.f32.mrf.mxu2 }
  0xd0   : > { %v462_v2 = vadd.f32 %v457_v0, %v415_v63 }
  0xd2   : > { %v469_v3 = vadd.f32 %v911_v46, %v462_v2 }
  0xd4   : > { %v472_v4 = vmax.f32 %v469_v3, 0.0 }
  0xd5   : > { %v522_v5 = vld [vmem:[#allocation2 + $0x1] sm:$0xff] }
  0xd6   : > { %v587_v6 = vld [vmem:[#allocation2 + $0x2] sm:$0xff]  ;;  %v500_v7 = vsel %vm488_vm1, %v472_v4, 0.0  ;;  %557 = vmatmul.f32.vlgmr.msra.gmra.mxu3 %v522_v5 }
  0xd7   : > { %622 = vmatmul.f32.vlgmr.msrb.gmra.mxu1 %v587_v6  ;;  %503 = vst [vmem:[#allocation2 + $0x10] sm:$0x3] %v500_v7 }
  0xde   : > { %v523_v8 = vld [vmem:[#allocation2 + $0x9] sm:$0xff] }
  0xdf   : > { %v588_v9 = vld [vmem:[#allocation2 + $0xa] sm:$0xff]  ;;  %560 = vmatmul.f32.gmra.mxu3 %v523_v8 }
  0xe0   : > { %625 = vmatmul.f32.vlgmr.msrb.gmra.mxu2 %v588_v9 }
  0xe7   : > { %583 = vmatmul.f32.vlgmr.msrb.gmra.mxu3 %v471_v62 }
 0x143   : > { %v581_v10 = vpop.f32.mrf.mxu0 }
 0x154   : > { %v623_v14 = vpop.f32.mrf.mxu1 }
 0x159   : > { %v558_v11 = vpop.f32.mrf.mxu3 }
 0x15a   : > { %v582_v12 = vadd.f32 %v581_v10, %v558_v11 }
 0x15c   : > { %v629_v15 = vadd.f32 %v623_v14, %v582_v12 }
 0x15e   : > { %v635_v16 = vadd.f32 %v912_v13, %v629_v15 }
 0x160   : > { %637 = vst [vmem:[%s308_s17] sm:$0xff] %v635_v16 }
 0x162   : > { %v561_v17 = vpop.f32.mrf.mxu3 }
 0x163   : > { %v626_v20 = vpop.f32.mrf.mxu2 }
 0x16a   : > { %v584_v18 = vpop.f32.mrf.mxu3 }
 0x16b   : > { %v585_v19 = vadd.f32 %v584_v18, %v561_v17 }
 0x16d   : > { %v630_v21 = vadd.f32 %v626_v20, %v585_v19 }
 0x16f   : > { %v636_v22 = vadd.f32 %v912_v13, %v630_v21 }
 0x171   : > { %638 = vst [vmem:[%s308_s17 + $0x8] sm:$0xff] %v636_v22 }
 0x172   : > { %1001 = shalt.err (!%p998_p9)
}
 0x173   : > { %s1066_s13 = smov 128   ;;  %s1067_s17 = smov 8  }
 0x174   : > { %839 = dma.vmem_to_hbm [thread:$0]  (%p1138_p4), %s655_s7, 256, %s657_s8, %s640_s9, %s1066_s13, %s1066_s13, %s1067_s17  }
 0x175 PF: > { %p856_p10 = scmp.ge.s32.totalorder %s1060_s23, 2  ;;  %s671_s24 = sand.u32 1, %s1040_s18  }
 0x176   : > { %s672_s25 = scalar_lea.sflag [#allocation5], %s671_s24 }
 0x177   : > { %p849_p11 = pnand %p856_p10, %p1145_p8 }
 0x179   : > { %p850_p12 = pneg %p849_p11 }
 0x17b   : > { %1035 = dma.done.wait (%p850_p12), %s672_s25, 256  }
 0x17c   : > { %1037 = vsyncadd (%p850_p12), %s672_s25, 4294967040  ;;  %s20_s23 = sadd.s32 1, %s1060_s23   ;;  %s1313_s18 = smov %s1044_s19 }
 0x17d   : > { %p17_p13 = scmp.ge.s32.totalorder %s20_s23, 4   ;;  %s1314_s19 = smov %s1048_s20 }
 0x17e   : > { %s1315_s20 = smov %s1151_s6  ;;  %s1316_s21 = smov %s1056_s22 }
 0x17f   : > { %s1317_s22 = smov %s1319_s26  ;;  %19 = sbr.rel (!%p17_p13) target bundleno = 6 (0x6), region = 93 }
 0x184   :  { %678 = vsyncpa [#allocation4], 1 }
 0x185   :  { %680 = vsyncpa [#allocation4 + $0x1], 1 }
 0x186   :  { %681 = vsyncpa [#allocation7], 1 }
 0x187   :  { %682 = vsyncpa [#allocation5], 1 }
 0x188   :  { %684 = vsyncpa [#allocation5 + $0x1], 1 }

</bundles_post_ra>
